<compile_context>
chip_gen: v5e
topology: v5e:2x2
jax: 0.10.0
libtpu: 0.0.40
codegen_flags: <defaults>
</compile_context>

<pallas_src>
import functools

import jax
import jax.numpy as jnp
from jax.experimental import pallas as pl
from jax.experimental.pallas import tpu as pltpu


def _round_up(x, m):
    return (x + m - 1) // m * m


def _vmem_capacity_bytes():
    """Physical VMEM of the current TPU generation (conservative fallback = v7x)."""
    try:
        info = pltpu.get_tpu_info()
        for attr in ("vmem_capacity_bytes", "vmem_size_bytes", "vmem_bytes"):
            v = getattr(info, attr, None)
            if v:
                return int(v)
    except Exception:
        pass
    return 64 * 1024 * 1024


# ----------------------------------------------------------------------------------
# Path 1: A fully VMEM-resident, all layers in one kernel invocation per sample.
# ----------------------------------------------------------------------------------
def _gin_resident_kernel(n_layers, eps_ref, a_ref, x_ref, w1_ref, b1_ref, w2_ref, b2_ref,
                         out_ref):
    # A is resident bf16; one VPU upcast per sample (exact for integer edge counts).
    a = a_ref[...].astype(jnp.float32)
    x = x_ref[0]                                   # (NP, P) f32
    for l in range(n_layers):                      # static loop, weights indexed statically
        s = jnp.dot(a, x, preferred_element_type=jnp.float32)
        z = (1.0 + eps_ref[l]) * x + s
        h = jnp.maximum(
            jnp.dot(z, w1_ref[l], preferred_element_type=jnp.float32) + b1_ref[l], 0.0)
        x = jnp.dot(h, w2_ref[l], preferred_element_type=jnp.float32) + b2_ref[l]
    out_ref[0] = x.astype(out_ref.dtype)           # lane-dense (NP, P) store


# ----------------------------------------------------------------------------------
# Path 2: A streamed in (NP, TILE_SRC) bf16 tiles (for graphs too big for VMEM).
# ----------------------------------------------------------------------------------
def _gin_tiled_kernel(eps_ref, a_ref, x_ref, w1_ref, b1_ref, w2_ref, b2_ref,
                      out_ref, xcur_ref, sacc_ref):
    l = pl.program_id(1)
    s = pl.program_id(2)
    n_layers = pl.num_programs(1)
    n_src = pl.num_programs(2)

    # Load this sample's input features into the persistent VMEM carry buffer.
    @pl.when(jnp.logical_and(l == 0, s == 0))
    def _():
        xcur_ref[...] = x_ref[0]

    # Partial aggregation for this source-node chunk (bf16 A upcast right before the dot).
    ts = a_ref.shape[1]
    src0 = pl.multiple_of(s * ts, ts)
    x_src = xcur_ref[pl.ds(src0, ts), :]
    partial = jnp.dot(a_ref[...].astype(jnp.float32), x_src,
                      preferred_element_type=jnp.float32)

    # Fold accumulator init and the (1 + eps) * X self term into the first chunk.
    @pl.when(s == 0)
    def _():
        sacc_ref[...] = (1.0 + eps_ref[l]) * xcur_ref[...] + partial

    @pl.when(s > 0)
    def _():
        sacc_ref[...] += partial

    # Layer finalize: 2-layer MLP; result becomes next layer's input.
    @pl.when(s == n_src - 1)
    def _():
        z = sacc_ref[...]
        h = jnp.maximum(
            jnp.dot(z, w1_ref[l], preferred_element_type=jnp.float32) + b1_ref[l], 0.0)
        xcur_ref[...] = jnp.dot(h, w2_ref[l], preferred_element_type=jnp.float32) + b2_ref[l]

    # Only the final layer's features are stored (lane-dense store).
    @pl.when(jnp.logical_and(l == n_layers - 1, s == n_src - 1))
    def _():
        out_ref[0] = xcur_ref[...].astype(out_ref.dtype)


def gin_forward_pallas(params, X, edge_index, n_nodes, *, force_tiled=False, tile_src=256):
    """Full GIN forward. X: [N, M, K] f32; edge_index: [2, E] int32 (row0=src j, row1=dst i)."""
    N, M, K = X.shape
    L = len(params)
    hidden = params[0]["w1"].shape[1]
    O = params[-1]["w2"].shape[1]

    P = _round_up(max(K, hidden, O), 128)           # padded feature (lane) dim
    vmem_cap = _vmem_capacity_bytes()
    f32 = 4

    # ---- per-generation gate: can dense A + weights live in VMEM? ----
    NP_res = _round_up(max(N, 8), 128)
    weight_bytes = 2 * (2 * L * P * P + 2 * L * P) * f32   # dbl-buffered resident stacks
    bytes_res = (2 * NP_res * NP_res * 2                    # bf16 A block (dbl-buffered)
                 + NP_res * NP_res * f32                    # in-kernel f32 upcast of A
                 + 4 * NP_res * P * f32                     # X-in + out blocks (dbl-buffered)
                 + 4 * NP_res * P * f32                     # s/z/h/x temporaries
                 + weight_bytes)
    use_resident = (not force_tiled) and bytes_res <= int(0.55 * vmem_cap)

    NP = NP_res if use_resident else _round_up(max(N, 8), tile_src)

    # --- plain-JAX glue (one-time, cheap): dense adjacency + padding/stacking ---
    src, dst = edge_index[0], edge_index[1]
    # A[i, j] = #edges (j -> i); small integer counts are exact in bf16.
    A = jnp.zeros((NP, NP), jnp.float32).at[dst, src].add(1.0).astype(jnp.bfloat16)

    # [N, M, K] -> [M, NP, P]  (samples outermost so every in-kernel op is 2-D)
    Xp = jnp.zeros((M, NP, P), jnp.float32).at[:, :N, :K].set(jnp.transpose(X, (1, 0, 2)))

    eps_all = jnp.zeros((L,), jnp.float32)
    W1 = jnp.zeros((L, P, P), jnp.float32)
    B1 = jnp.zeros((L, 1, P), jnp.float32)
    W2 = jnp.zeros((L, P, P), jnp.float32)
    B2 = jnp.zeros((L, 1, P), jnp.float32)
    for li, p in enumerate(params):
        di, dh = p["w1"].shape
        do = p["w2"].shape[1]
        eps_all = eps_all.at[li].set(p["eps"][0])
        W1 = W1.at[li, :di, :dh].set(p["w1"])
        B1 = B1.at[li, 0, :dh].set(p["b1"][0])
        W2 = W2.at[li, :dh, :do].set(p["w2"])
        B2 = B2.at[li, 0, :do].set(p["b2"][0])

    smem_spec = pl.BlockSpec(memory_space=pltpu.MemorySpace.SMEM)

    if use_resident:
        vmem_limit = int(min(max(bytes_res + (4 << 20), 16 << 20), int(0.55 * vmem_cap)))
        out = pl.pallas_call(
            functools.partial(_gin_resident_kernel, L),
            out_shape=jax.ShapeDtypeStruct((M, NP, P), jnp.float32),
            grid=(M,),
            in_specs=[
                smem_spec,                                            # eps  [L]
                pl.BlockSpec((NP, NP), lambda m: (0, 0)),             # A    resident (bf16)
                pl.BlockSpec((1, NP, P), lambda m: (m, 0, 0)),        # X    [M, NP, P]
                pl.BlockSpec((L, P, P), lambda m: (0, 0, 0)),         # W1   resident
                pl.BlockSpec((L, 1, P), lambda m: (0, 0, 0)),         # B1
                pl.BlockSpec((L, P, P), lambda m: (0, 0, 0)),         # W2
                pl.BlockSpec((L, 1, P), lambda m: (0, 0, 0)),         # B2
            ],
            out_specs=pl.BlockSpec((1, NP, P), lambda m: (m, 0, 0)),
            compiler_params=pltpu.CompilerParams(
                dimension_semantics=("parallel",),
                vmem_limit_bytes=vmem_limit),
        )(eps_all, A, Xp, W1, B1, W2, B2)
    else:
        n_src = NP // tile_src
        bytes_tiled = (2 * NP * tile_src * 2            # bf16 A tiles (dbl-buffered)
                       + NP * tile_src * f32            # f32 upcast of the A tile
                       + 4 * NP * P * f32               # X-in + out blocks (dbl-buffered)
                       + 2 * NP * P * f32               # xcur + sacc scratch
                       + 4 * NP * P * f32               # z/h temporaries
                       + weight_bytes)
        vmem_limit = int(min(max(bytes_tiled + (4 << 20), 16 << 20), int(0.55 * vmem_cap)))
        out = pl.pallas_call(
            _gin_tiled_kernel,
            out_shape=jax.ShapeDtypeStruct((M, NP, P), jnp.float32),
            grid=(M, L, n_src),
            in_specs=[
                smem_spec,                                                  # eps  [L]
                pl.BlockSpec((NP, tile_src), lambda m, l, s: (0, s)),       # A tiles (bf16)
                pl.BlockSpec((1, NP, P), lambda m, l, s: (m, 0, 0)),        # X    [M, NP, P]
                pl.BlockSpec((L, P, P), lambda m, l, s: (0, 0, 0)),         # W1   resident
                pl.BlockSpec((L, 1, P), lambda m, l, s: (0, 0, 0)),         # B1
                pl.BlockSpec((L, P, P), lambda m, l, s: (0, 0, 0)),         # W2
                pl.BlockSpec((L, 1, P), lambda m, l, s: (0, 0, 0)),         # B2
            ],
            out_specs=pl.BlockSpec((1, NP, P), lambda m, l, s: (m, 0, 0)),
            scratch_shapes=[pltpu.VMEM((NP, P), jnp.float32),   # X carry across layers
                            pltpu.VMEM((NP, P), jnp.float32)],  # S accumulator
            compiler_params=pltpu.CompilerParams(
                dimension_semantics=("parallel", "arbitrary", "arbitrary"),
                vmem_limit_bytes=vmem_limit),
        )(eps_all, A, Xp, W1, B1, W2, B2)

    # back to the module's [N, M, out_dims] layout
    return jnp.transpose(out[:, :N, :O], (1, 0, 2))


def gin_forward_ref(params, X, edge_index, n_nodes):
    """Pure-JAX f32 reference matching the PyTorch module semantics."""
    src, dst = edge_index[0], edge_index[1]
    A = jnp.zeros((n_nodes, n_nodes), jnp.float32).at[dst, src].add(1.0)
    for p in params:
        S = jnp.einsum("ij,jmk->imk", A, X)
        Z = (1.0 + p["eps"][0]) * X + S
        H = jnp.maximum(jnp.einsum("nmk,kh->nmh", Z, p["w1"]) + p["b1"], 0.0)
        X = jnp.einsum("nmh,ho->nmo", H, p["w2"]) + p["b2"]
    return X


def init_gin_params(key, n_layers, in_dims, hidden_dims, out_dims):
    """Deterministic parameter init mirroring GIN.__init__ layer shapes.
    create_mlp is realized as Linear(in, hidden) -> ReLU -> Linear(hidden, out)."""
    params = []
    d_in = in_dims
    for li in range(n_layers):
        d_out = hidden_dims if li < n_layers - 1 else out_dims
        key, k_eps, k_w1, k_b1, k_w2, k_b2 = jax.random.split(key, 6)
        mlp_hidden = hidden_dims
        s1 = 1.0 / jnp.sqrt(jnp.float32(d_in))
        s2 = 1.0 / jnp.sqrt(jnp.float32(mlp_hidden))
        params.append({
            "eps": jax.random.normal(k_eps, (1,), jnp.float32),            # torch.randn(1)
            "w1": jax.random.uniform(k_w1, (d_in, mlp_hidden), jnp.float32, -s1, s1),
            "b1": jax.random.uniform(k_b1, (1, mlp_hidden), jnp.float32, -s1, s1),
            "w2": jax.random.uniform(k_w2, (mlp_hidden, d_out), jnp.float32, -s2, s2),
            "b2": jax.random.uniform(k_b2, (1, d_out), jnp.float32, -s2, s2),
        })
        d_in = d_out
    return params


if __name__ == "__main__":
    key = jax.random.PRNGKey(0)

    # Small shapes consistent with GIN's [N, M, K] input contract.
    N, M, E = 16, 8, 48
    in_dims, hidden_dims, out_dims, n_layers = 32, 32, 16, 3

    key, k_x, k_src, k_dst, k_par = jax.random.split(key, 5)
    X = jax.random.normal(k_x, (N, M, in_dims), jnp.float32)
    edge_index = jnp.stack([
        jax.random.randint(k_src, (E,), 0, N, jnp.int32),
        jax.random.randint(k_dst, (E,), 0, N, jnp.int32),
    ], axis=0)                                              # [2, E]

    params = init_gin_params(k_par, n_layers, in_dims, hidden_dims, out_dims)
    ref = jax.block_until_ready(gin_forward_ref(params, X, edge_index, N))

    # Primary (A-resident) path.
    out = jax.block_until_ready(gin_forward_pallas(params, X, edge_index, N))
    assert out.shape == (N, M, out_dims), out.shape
    assert jnp.allclose(out, ref, atol=1e-3, rtol=1e-3), float(jnp.abs(out - ref).max())

    # Also exercise the A-streamed fallback path (multi-chunk accumulation) on a
    # slightly larger graph so n_src > 1.
    N2, E2 = 200, 600
    key, k_x2, k_s2, k_d2 = jax.random.split(key, 4)
    X2 = jax.random.normal(k_x2, (N2, M, in_dims), jnp.float32)
    ei2 = jnp.stack([
        jax.random.randint(k_s2, (E2,), 0, N2, jnp.int32),
        jax.random.randint(k_d2, (E2,), 0, N2, jnp.int32),
    ], axis=0)
    ref2 = jax.block_until_ready(gin_forward_ref(params, X2, ei2, N2))
    out2 = jax.block_until_ready(
        gin_forward_pallas(params, X2, ei2, N2, force_tiled=True, tile_src=128))
    assert out2.shape == (N2, M, out_dims), out2.shape
    assert jnp.allclose(out2, ref2, atol=1e-3, rtol=1e-3), float(jnp.abs(out2 - ref2).max())

    print("KERNEL_OK")
</pallas_src>

<mosaic_0001>
module attributes {stable_mosaic.version = 11 : i64} {
  func.func @_gin_resident_kernel(%arg0: i32, %arg1: memref<3xf32, #tpu.memory_space<smem>>, %arg2: memref<128x128xbf16, #tpu.memory_space<vmem>>, %arg3: memref<1x128x128xf32, #tpu.memory_space<vmem>>, %arg4: memref<3x128x128xf32, #tpu.memory_space<vmem>>, %arg5: memref<3x1x128xf32, #tpu.memory_space<vmem>>, %arg6: memref<3x128x128xf32, #tpu.memory_space<vmem>>, %arg7: memref<3x1x128xf32, #tpu.memory_space<vmem>>, %arg8: memref<1x128x128xf32, #tpu.memory_space<vmem>>) attributes {dimension_semantics = [#tpu.dimension_semantics<parallel>], iteration_bounds = array<i64: 8>, scalar_prefetch = 0 : i64, scratch_operands = 0 : i64, tpu.core_type = #tpu.core_type<tc>, window_params = [{transform_indices = @transform_0, window_bounds = array<i64: 3>}, {pipeline_mode = #tpu.pipeline_mode<synchronous>, transform_indices = @transform_1, window_bounds = array<i64: 128, 128>}, {transform_indices = @transform_2, window_bounds = array<i64: 1, 128, 128>}, {pipeline_mode = #tpu.pipeline_mode<synchronous>, transform_indices = @transform_3, window_bounds = array<i64: 3, 128, 128>}, {pipeline_mode = #tpu.pipeline_mode<synchronous>, transform_indices = @transform_4, window_bounds = array<i64: 3, 1, 128>}, {pipeline_mode = #tpu.pipeline_mode<synchronous>, transform_indices = @transform_5, window_bounds = array<i64: 3, 128, 128>}, {pipeline_mode = #tpu.pipeline_mode<synchronous>, transform_indices = @transform_6, window_bounds = array<i64: 3, 1, 128>}, {transform_indices = @transform_7, window_bounds = array<i64: 1, 128, 128>}]} {
    %c0 = arith.constant 0 : index
    %c0_0 = arith.constant 0 : index
    %0 = vector.load %arg2[%c0, %c0_0] : memref<128x128xbf16, #tpu.memory_space<vmem>>, vector<128x128xbf16>
    %1 = arith.extf %0 : vector<128x128xbf16> to vector<128x128xf32>
    %c0_1 = arith.constant 0 : index
    %c0_2 = arith.constant 0 : index
    %c0_3 = arith.constant 0 : index
    %2 = vector.load %arg3[%c0_1, %c0_2, %c0_3] : memref<1x128x128xf32, #tpu.memory_space<vmem>>, vector<1x128x128xf32>
    %3 = vector.shape_cast %2 : vector<1x128x128xf32> to vector<128x128xf32>
    %cst = arith.constant dense<0.000000e+00> : vector<128x128xf32>
    %4 = tpu.matmul %1, %3, %cst {dimension_numbers = #tpu.dot_dimension_numbers<[1], [0], [0], [1], [0, 0, 1, 1], [], []>} : vector<128x128xf32>, vector<128x128xf32>, vector<128x128xf32> -> vector<128x128xf32>
    %c0_4 = arith.constant 0 : index
    %5 = memref.load %arg1[%c0_4] : memref<3xf32, #tpu.memory_space<smem>>
    %cst_5 = arith.constant 1.000000e+00 : f32
    %6 = arith.addf %cst_5, %5 : f32
    %7 = vector.broadcast %6 : f32 to vector<128x128xf32>
    %8 = arith.mulf %7, %3 : vector<128x128xf32>
    %9 = arith.addf %8, %4 : vector<128x128xf32>
    %c0_6 = arith.constant 0 : index
    %c0_7 = arith.constant 0 : index
    %c0_8 = arith.constant 0 : index
    %10 = vector.load %arg4[%c0_6, %c0_7, %c0_8] : memref<3x128x128xf32, #tpu.memory_space<vmem>>, vector<1x128x128xf32>
    %11 = vector.shape_cast %10 : vector<1x128x128xf32> to vector<128x128xf32>
    %cst_9 = arith.constant dense<0.000000e+00> : vector<128x128xf32>
    %12 = tpu.matmul %9, %11, %cst_9 {dimension_numbers = #tpu.dot_dimension_numbers<[1], [0], [0], [1], [0, 0, 1, 1], [], []>} : vector<128x128xf32>, vector<128x128xf32>, vector<128x128xf32> -> vector<128x128xf32>
    %c0_10 = arith.constant 0 : index
    %c0_11 = arith.constant 0 : index
    %c0_12 = arith.constant 0 : index
    %13 = vector.load %arg5[%c0_10, %c0_11, %c0_12] : memref<3x1x128xf32, #tpu.memory_space<vmem>>, vector<1x1x128xf32>
    %14 = vector.shape_cast %13 : vector<1x1x128xf32> to vector<1x128xf32>
    %15 = vector.broadcast %14 : vector<1x128xf32> to vector<128x128xf32>
    %16 = arith.addf %12, %15 : vector<128x128xf32>
    %cst_13 = arith.constant 0.000000e+00 : f32
    %17 = vector.broadcast %cst_13 : f32 to vector<128x128xf32>
    %18 = arith.maximumf %16, %17 : vector<128x128xf32>
    %c0_14 = arith.constant 0 : index
    %c0_15 = arith.constant 0 : index
    %c0_16 = arith.constant 0 : index
    %19 = vector.load %arg6[%c0_14, %c0_15, %c0_16] : memref<3x128x128xf32, #tpu.memory_space<vmem>>, vector<1x128x128xf32>
    %20 = vector.shape_cast %19 : vector<1x128x128xf32> to vector<128x128xf32>
    %cst_17 = arith.constant dense<0.000000e+00> : vector<128x128xf32>
    %21 = tpu.matmul %18, %20, %cst_17 {dimension_numbers = #tpu.dot_dimension_numbers<[1], [0], [0], [1], [0, 0, 1, 1], [], []>} : vector<128x128xf32>, vector<128x128xf32>, vector<128x128xf32> -> vector<128x128xf32>
    %c0_18 = arith.constant 0 : index
    %c0_19 = arith.constant 0 : index
    %c0_20 = arith.constant 0 : index
    %22 = vector.load %arg7[%c0_18, %c0_19, %c0_20] : memref<3x1x128xf32, #tpu.memory_space<vmem>>, vector<1x1x128xf32>
    %23 = vector.shape_cast %22 : vector<1x1x128xf32> to vector<1x128xf32>
    %24 = vector.broadcast %23 : vector<1x128xf32> to vector<128x128xf32>
    %25 = arith.addf %21, %24 : vector<128x128xf32>
    %cst_21 = arith.constant dense<0.000000e+00> : vector<128x128xf32>
    %26 = tpu.matmul %1, %25, %cst_21 {dimension_numbers = #tpu.dot_dimension_numbers<[1], [0], [0], [1], [0, 0, 1, 1], [], []>} : vector<128x128xf32>, vector<128x128xf32>, vector<128x128xf32> -> vector<128x128xf32>
    %c1 = arith.constant 1 : index
    %27 = memref.load %arg1[%c1] : memref<3xf32, #tpu.memory_space<smem>>
    %cst_22 = arith.constant 1.000000e+00 : f32
    %28 = arith.addf %cst_22, %27 : f32
    %29 = vector.broadcast %28 : f32 to vector<128x128xf32>
    %30 = arith.mulf %29, %25 : vector<128x128xf32>
    %31 = arith.addf %30, %26 : vector<128x128xf32>
    %c1_23 = arith.constant 1 : index
    %c0_24 = arith.constant 0 : index
    %c0_25 = arith.constant 0 : index
    %32 = vector.load %arg4[%c1_23, %c0_24, %c0_25] : memref<3x128x128xf32, #tpu.memory_space<vmem>>, vector<1x128x128xf32>
    %33 = vector.shape_cast %32 : vector<1x128x128xf32> to vector<128x128xf32>
    %cst_26 = arith.constant dense<0.000000e+00> : vector<128x128xf32>
    %34 = tpu.matmul %31, %33, %cst_26 {dimension_numbers = #tpu.dot_dimension_numbers<[1], [0], [0], [1], [0, 0, 1, 1], [], []>} : vector<128x128xf32>, vector<128x128xf32>, vector<128x128xf32> -> vector<128x128xf32>
    %c1_27 = arith.constant 1 : index
    %c0_28 = arith.constant 0 : index
    %c0_29 = arith.constant 0 : index
    %35 = vector.load %arg5[%c1_27, %c0_28, %c0_29] : memref<3x1x128xf32, #tpu.memory_space<vmem>>, vector<1x1x128xf32>
    %36 = vector.shape_cast %35 : vector<1x1x128xf32> to vector<1x128xf32>
    %37 = vector.broadcast %36 : vector<1x128xf32> to vector<128x128xf32>
    %38 = arith.addf %34, %37 : vector<128x128xf32>
    %cst_30 = arith.constant 0.000000e+00 : f32
    %39 = vector.broadcast %cst_30 : f32 to vector<128x128xf32>
    %40 = arith.maximumf %38, %39 : vector<128x128xf32>
    %c1_31 = arith.constant 1 : index
    %c0_32 = arith.constant 0 : index
    %c0_33 = arith.constant 0 : index
    %41 = vector.load %arg6[%c1_31, %c0_32, %c0_33] : memref<3x128x128xf32, #tpu.memory_space<vmem>>, vector<1x128x128xf32>
    %42 = vector.shape_cast %41 : vector<1x128x128xf32> to vector<128x128xf32>
    %cst_34 = arith.constant dense<0.000000e+00> : vector<128x128xf32>
    %43 = tpu.matmul %40, %42, %cst_34 {dimension_numbers = #tpu.dot_dimension_numbers<[1], [0], [0], [1], [0, 0, 1, 1], [], []>} : vector<128x128xf32>, vector<128x128xf32>, vector<128x128xf32> -> vector<128x128xf32>
    %c1_35 = arith.constant 1 : index
    %c0_36 = arith.constant 0 : index
    %c0_37 = arith.constant 0 : index
    %44 = vector.load %arg7[%c1_35, %c0_36, %c0_37] : memref<3x1x128xf32, #tpu.memory_space<vmem>>, vector<1x1x128xf32>
    %45 = vector.shape_cast %44 : vector<1x1x128xf32> to vector<1x128xf32>
    %46 = vector.broadcast %45 : vector<1x128xf32> to vector<128x128xf32>
    %47 = arith.addf %43, %46 : vector<128x128xf32>
    %cst_38 = arith.constant dense<0.000000e+00> : vector<128x128xf32>
    %48 = tpu.matmul %1, %47, %cst_38 {dimension_numbers = #tpu.dot_dimension_numbers<[1], [0], [0], [1], [0, 0, 1, 1], [], []>} : vector<128x128xf32>, vector<128x128xf32>, vector<128x128xf32> -> vector<128x128xf32>
    %c2 = arith.constant 2 : index
    %49 = memref.load %arg1[%c2] : memref<3xf32, #tpu.memory_space<smem>>
    %cst_39 = arith.constant 1.000000e+00 : f32
    %50 = arith.addf %cst_39, %49 : f32
    %51 = vector.broadcast %50 : f32 to vector<128x128xf32>
    %52 = arith.mulf %51, %47 : vector<128x128xf32>
    %53 = arith.addf %52, %48 : vector<128x128xf32>
    %c2_40 = arith.constant 2 : index
    %c0_41 = arith.constant 0 : index
    %c0_42 = arith.constant 0 : index
    %54 = vector.load %arg4[%c2_40, %c0_41, %c0_42] : memref<3x128x128xf32, #tpu.memory_space<vmem>>, vector<1x128x128xf32>
    %55 = vector.shape_cast %54 : vector<1x128x128xf32> to vector<128x128xf32>
    %cst_43 = arith.constant dense<0.000000e+00> : vector<128x128xf32>
    %56 = tpu.matmul %53, %55, %cst_43 {dimension_numbers = #tpu.dot_dimension_numbers<[1], [0], [0], [1], [0, 0, 1, 1], [], []>} : vector<128x128xf32>, vector<128x128xf32>, vector<128x128xf32> -> vector<128x128xf32>
    %c2_44 = arith.constant 2 : index
    %c0_45 = arith.constant 0 : index
    %c0_46 = arith.constant 0 : index
    %57 = vector.load %arg5[%c2_44, %c0_45, %c0_46] : memref<3x1x128xf32, #tpu.memory_space<vmem>>, vector<1x1x128xf32>
    %58 = vector.shape_cast %57 : vector<1x1x128xf32> to vector<1x128xf32>
    %59 = vector.broadcast %58 : vector<1x128xf32> to vector<128x128xf32>
    %60 = arith.addf %56, %59 : vector<128x128xf32>
    %cst_47 = arith.constant 0.000000e+00 : f32
    %61 = vector.broadcast %cst_47 : f32 to vector<128x128xf32>
    %62 = arith.maximumf %60, %61 : vector<128x128xf32>
    %c2_48 = arith.constant 2 : index
    %c0_49 = arith.constant 0 : index
    %c0_50 = arith.constant 0 : index
    %63 = vector.load %arg6[%c2_48, %c0_49, %c0_50] : memref<3x128x128xf32, #tpu.memory_space<vmem>>, vector<1x128x128xf32>
    %64 = vector.shape_cast %63 : vector<1x128x128xf32> to vector<128x128xf32>
    %cst_51 = arith.constant dense<0.000000e+00> : vector<128x128xf32>
    %65 = tpu.matmul %62, %64, %cst_51 {dimension_numbers = #tpu.dot_dimension_numbers<[1], [0], [0], [1], [0, 0, 1, 1], [], []>} : vector<128x128xf32>, vector<128x128xf32>, vector<128x128xf32> -> vector<128x128xf32>
    %c2_52 = arith.constant 2 : index
    %c0_53 = arith.constant 0 : index
    %c0_54 = arith.constant 0 : index
    %66 = vector.load %arg7[%c2_52, %c0_53, %c0_54] : memref<3x1x128xf32, #tpu.memory_space<vmem>>, vector<1x1x128xf32>
    %67 = vector.shape_cast %66 : vector<1x1x128xf32> to vector<1x128xf32>
    %68 = vector.broadcast %67 : vector<1x128xf32> to vector<128x128xf32>
    %69 = arith.addf %65, %68 : vector<128x128xf32>
    %c0_55 = arith.constant 0 : index
    %c0_56 = arith.constant 0 : index
    %c0_57 = arith.constant 0 : index
    %70 = vector.load %arg8[%c0_55, %c0_56, %c0_57] : memref<1x128x128xf32, #tpu.memory_space<vmem>>, vector<1x128x128xf32>
    %71 = vector.shape_cast %70 : vector<1x128x128xf32> to vector<128x128xf32>
    %72 = vector.shape_cast %69 : vector<128x128xf32> to vector<1x128x128xf32>
    tpu.vector_store %arg8[%c0_55, %c0_56, %c0_57], %72 {strides = array<i32>} : memref<1x128x128xf32, #tpu.memory_space<vmem>>, vector<1x128x128xf32>,
    return
  }
  func.func @transform_0(%arg0: i32) -> i32 {
    %c0_i32 = arith.constant 0 : i32
    %c0_i32_0 = arith.constant 0 : i32
    return %c0_i32 : i32
  }
  func.func @transform_1(%arg0: i32) -> (i32, i32) {
    %c0_i32 = arith.constant 0 : i32
    %c0_i32_0 = arith.constant 0 : i32
    %c0_i32_1 = arith.constant 0 : i32
    return %c0_i32, %c0_i32_0 : i32, i32
  }
  func.func @transform_2(%arg0: i32) -> (i32, i32, i32) {
    %c0_i32 = arith.constant 0 : i32
    %c0_i32_0 = arith.constant 0 : i32
    %c0_i32_1 = arith.constant 0 : i32
    return %arg0, %c0_i32, %c0_i32_0 : i32, i32, i32
  }
  func.func @transform_3(%arg0: i32) -> (i32, i32, i32) {
    %c0_i32 = arith.constant 0 : i32
    %c0_i32_0 = arith.constant 0 : i32
    %c0_i32_1 = arith.constant 0 : i32
    %c0_i32_2 = arith.constant 0 : i32
    return %c0_i32, %c0_i32_0, %c0_i32_1 : i32, i32, i32
  }
  func.func @transform_4(%arg0: i32) -> (i32, i32, i32) {
    %c0_i32 = arith.constant 0 : i32
    %c0_i32_0 = arith.constant 0 : i32
    %c0_i32_1 = arith.constant 0 : i32
    %c0_i32_2 = arith.constant 0 : i32
    return %c0_i32, %c0_i32_0, %c0_i32_1 : i32, i32, i32
  }
  func.func @transform_5(%arg0: i32) -> (i32, i32, i32) {
    %c0_i32 = arith.constant 0 : i32
    %c0_i32_0 = arith.constant 0 : i32
    %c0_i32_1 = arith.constant 0 : i32
    %c0_i32_2 = arith.constant 0 : i32
    return %c0_i32, %c0_i32_0, %c0_i32_1 : i32, i32, i32
  }
  func.func @transform_6(%arg0: i32) -> (i32, i32, i32) {
    %c0_i32 = arith.constant 0 : i32
    %c0_i32_0 = arith.constant 0 : i32
    %c0_i32_1 = arith.constant 0 : i32
    %c0_i32_2 = arith.constant 0 : i32
    return %c0_i32, %c0_i32_0, %c0_i32_1 : i32, i32, i32
  }
  func.func @transform_7(%arg0: i32) -> (i32, i32, i32) {
    %c0_i32 = arith.constant 0 : i32
    %c0_i32_0 = arith.constant 0 : i32
    %c0_i32_1 = arith.constant 0 : i32
    return %arg0, %c0_i32, %c0_i32_0 : i32, i32, i32
  }
}

</mosaic_0001>

<bundles_post_ra>
// kernel: tpu_custom_call.1
= control target key start
LH: loop header
LB: loop body
LE: loop exit
PB: predicated region body
PF: predicated region fallthrough
CT: control target
= control target key end

     0   :  { %s2574_s0 = inlined_call_operand.hbm [shape: f32[3], index: 0, kind: input, shape index: {}]   ;;  %s2575_s1 = inlined_call_operand.hbm [shape: bf16[128,128], index: 1, kind: input, shape index: {}]   ;;  %s2576_s2 = inlined_call_operand.hbm [shape: f32[8,128,128], index: 2, kind: input, shape index: {}]   ;;  %s2577_s3 = inlined_call_operand.hbm [shape: f32[3,128,128], index: 3, kind: input, shape index: {}]   ;;  %s2578_s4 = inlined_call_operand.vmem [shape: f32[3,1,128], index: 4, kind: input, shape index: {}]   ;;  %s2579_s5 = inlined_call_operand.hbm [shape: f32[3,128,128], index: 5, kind: input, shape index: {}]   ;;  %s2580_s6 = inlined_call_operand.hbm [shape: f32[3,1,128], index: 6, kind: input, shape index: {}]   ;;  %s2581_s7 = inlined_call_operand.hbm [shape: f32[8,128,128], index: 7, kind: output, shape index: {}]  }
   0x1   :  { %2584 = sst [smem:[#allocation20_spill]] %s2574_s0 }
   0x2   :  { %12 = vsyncpa [#allocation5], 0 }
   0x3   :  { %13 = vsyncpa [#allocation3], 0 }
   0x4   :  { %14 = vsyncpa [#allocation8], 0 }
   0x5   :  { %16 = vsyncpa [#allocation8 + $0x1], 0 }
   0x6   :  { %17 = vsyncpa [#allocation11], 0 }
   0x7   :  { %18 = vsyncpa [#allocation4], 0 }
   0x8   :  { %20 = vsyncpa [#allocation4 + $0x1], 0  ;;  %s1980_s24 = smov 0   ;;  %s1982_s25 = smov 0  }
   0x9   :  { %s1984_s26 = smov 0   ;;  %s1986_s27 = smov 0  }
   0xa LB: > { %s2001_s28 = sadd.s32 4294967295, %s1925_s27   ;;  %s1450_s29 = sadd.s32 4294967294, %s1925_s27   ;;  %s1925_s27 = sphi %s1986_s27, %s2597_s27   ;;  %s1921_s26 = sphi %s1984_s26, %s2596_s26   ;;  %s1917_s25 = sphi %s1982_s25, %s2595_s25   ;;  %s1913_s24 = sphi %s1980_s24, %s2594_s24  }
   0xb   : > { %p88_p0 = scmp.ne.s32.totalorder %s1917_s25, %s1913_s24  ;;  %p89_p1 = scmp.eq.s32.totalorder %s2001_s28, 0 }
   0xc   : > { %p196_p2 = scmp.eq.s32.totalorder %s2001_s28, 7  ;;  %p202_p3 = scmp.eq.s32.totalorder %s1450_s29, 7 }
   0xd   : > { %p2010_p4 = por %p89_p1, %p88_p0  ;;  %p1451_p5 = scmp.ge.s32.totalorder %s1925_s27, 1 }
   0xe   : > { %p2015_p6 = por %p202_p3, %p88_p0  ;;  %p209_p7 = scmp.lt.s32.totalorder %s1925_s27, 9 }
   0xf   : > { %s244_s11 = sshll.u32 %s2577_s3, 4  ;;  %s1927_s13 = smov [#allocation9]   ;;  %s245_s11 = int_to_ptr.hbm [resolvable:$true] %s244_s11 }
  0x10   : > { %p2023_p8 = pnand %p1451_p5, %p209_p7  ;;  %s246_s14 = sshll.u32 %s1927_s13, 4  ;;  %s247_s14 = int_to_ptr.vmem [resolvable:$true] %s246_s14 }
  0x11   : > { %s261_s18 = sshll.u32 %s2579_s5, 4  ;;  %s2582_s19 = smov 128   ;;  %s262_s18 = int_to_ptr.hbm [resolvable:$true] %s261_s18 }
  0x12   : > { %p1591_p9 = pneg %p2023_p8  ;;  %s2583_s20 = smov 8  }
  0x13   : > { %s1930_s21 = smov [#allocation10]   ;;  %s2589_s0 = sld [smem:[#allocation20_spill]] }
  0x14   : > { %p2031_p10 = pnand %p1591_p9, %p89_p1  ;;  %s263_s22 = sshll.u32 %s1930_s21, 4  ;;  %s264_s22 = int_to_ptr.vmem [resolvable:$true] %s263_s22 }
  0x15   : > { %s230_s16 = sshll.u32 %s2575_s1, 4  ;;  %s1931_s17 = smov [#allocation2]   ;;  %s231_s16 = int_to_ptr.hbm [resolvable:$true] %s230_s16 }
  0x16   : > { %1600 = dma.hbm_to_vmem [thread:$0]  (!%p2031_p10), %s245_s11, 6144, %s247_s14, [#allocation8], %s2582_s19, %s2582_s19, %s2583_s20  }
  0x17   : > { %1603 = dma.hbm_to_vmem [thread:$0]  (!%p2031_p10), %s262_s18, 6144, %s264_s22, [#allocation11], %s2582_s19, %s2582_s19, %s2583_s20  }
  0x18   : > { %s1932_s11 = smov [#allocation6]   ;;  %s1933_s21 = smov 64  }
  0x19   : > { %s221_s9 = sshll.u32 %s2589_s0, 4  ;;  %s232_s14 = sshll.u32 %s1932_s11, 4  ;;  %s222_s9 = int_to_ptr.hbm [resolvable:$true] %s221_s9  ;;  %s233_s14 = int_to_ptr.vmem [resolvable:$true] %s232_s14 }
  0x1a   : > { %1594 = dma.hbm_to_smem (!%p2031_p10), %s222_s9, 16, %s1931_s17, [#allocation5]  }
  0x1b   : > { %s1934_s18 = smov 4   ;;  %s275_s29 = sshll.u32 %s2580_s6, 4  ;;  %s276_s29 = int_to_ptr.hbm [resolvable:$true] %s275_s29 }
  0x1c   : > { %1597 = dma.hbm_to_vmem [thread:$0]  (!%p2031_p10), %s231_s16, 1024, %s233_s14, [#allocation3], %s1933_s21, %s1933_s21, %s1934_s18  }
  0x1d   : > { %s1935_s9 = smov [#allocation12]   ;;  %s1936_s13 = smov 16  }
  0x1e   : > { %s277_s10 = sshll.u32 %s1935_s9, 4  ;;  %s1937_s17 = smov 1   ;;  %s278_s10 = int_to_ptr.vmem [resolvable:$true] %s277_s10 }
  0x1f   : > { %1606 = dma.hbm_to_vmem [thread:$0]  (!%p2031_p10), %s276_s29, 48, %s278_s10, [#allocation11], %s1936_s13, %s1936_s13, %s1937_s17  }
  0x20   : > { %s2064_s11 = sadd.s32 1, %s1925_s27   ;;  %s75_s14 = sadd.s32 1, %s1921_s26 }
  0x21   : > { %s72_s16 = ssub.s32 %s1925_s27, %s2064_s11  ;;  %p82_p12 = scmp.ne.s32.totalorder %s1921_s26, %s1917_s25 }
  0x22   : > { %p73_p11 = scmp.eq.s32.totalorder %s72_s16, 0  ;;  %p83_p13 = scmp.eq.s32.totalorder %s1925_s27, 0 }
  0x23   : > { %p1620_p0 = scmp.lt.s32.totalorder %s1925_s27, 8  ;;  %p2078_p5 = por %p196_p2, %p82_p12 }
  0x24   : > { %s2074_s21 = scalar_select %p73_p11, %s1921_s26, %s75_s14  }
  0x25   : > { %p84_p3 = por %p83_p13, %p82_p12  ;;  %s291_s15 = sand.u32 1, %s1925_s27  }
  0x26   : > { %s293_s22 = sand.u32 1, %s1921_s26   ;;  %s1478_s29 = sshll.u32 %s1925_s27, 7 }
  0x27   : > { %s1458_s23 = sshll.u32 %s293_s22, 7  ;;  %s300_s13 = scalar_lea.hbm %s2576_s2, %s1478_s29 }
  0x28   : > { %s295_s17 = scalar_lea.vmem [#allocation7], %s1458_s23  ;;  %s301_s19 = sshll.u32 %s300_s13, 4  ;;  %s302_s19 = int_to_ptr.hbm [resolvable:$true] %s301_s19 }
  0x29   : > { %s303_s16 = sshll.u32 %s295_s17, 4  ;;  %p2090_p7 = pnand %p1620_p0, %p84_p3  ;;  %s304_s16 = int_to_ptr.vmem [resolvable:$true] %s303_s16 }
  0x2a   : > { %s292_s20 = scalar_lea.sflag [#allocation8], %s291_s15  ;;  %s1813_s0 = sshra.s32 %s302_s19, 4  ;;  %s1814_s0 = int_to_ptr.hbm [resolvable:$true] %s1813_s0 }
  0x2b   : > { %s1815_s22 = scalar_lea.hbm %s1814_s0, 128  ;;  %p1817_p9 = pneg %p2090_p7 }
  0x2c   : > { %p1816_p2 = scmp.ne.s32.totalorder %s1814_s0, %s1815_s22  ;;  %s1820_s9 = scalar_lea.hbm %s2576_s2, 1024 }
  0x2d   : > { %p1821_p12 = scmp.lt.s32.totalorder %s1814_s0, %s2576_s2  ;;  %p1822_p13 = scmp.lt.s32.totalorder %s1820_s9, %s1815_s22 }
  0x2e   : > { %p1818_p10 = pnand %p1817_p9, %p1816_p2 }
  0x2f   : > { %p1823_p0 = por %p1822_p13, %p1821_p12 }
  0x30   : > { %p1819_p11 = pneg %p1818_p10 }
  0x32   : > { %p1824_p3 = pnand %p1823_p0, %p1819_p11 }
  0x34   : > { %1827 = shalt.err (!%p1824_p3)
}
  0x35   : > { %s2592_s15 = smov 8   ;;  %s2593_s17 = smov 128  }
  0x36   : > { %1610 = dma.hbm_to_vmem [thread:$0]  (!%p2090_p7), %s302_s19, 2048, %s304_s16, %s292_s20, %s2593_s17, %s2593_s17, %s2592_s15  }
  0x37   : > { %315 = sbr.rel (%p2023_p8) target bundleno = 1713 (0x6b1), region = 48 }
  0x3c   : > { %1888 = dma.done.wait (%p89_p1), [#allocation5], 16  }
  0x3d   : > { %1890 = vsyncadd (%p89_p1), [#allocation5], 4294967280 }
  0x3e   : > { %1892 = dma.done.wait (%p89_p1), [#allocation3], 1024  }
  0x3f   : > { %1894 = vsyncadd (%p89_p1), [#allocation3], 4294966272  ;;  %s327_s0 = sand.u32 1, %s2001_s28   ;;  %s329_s19 = sand.u32 1, %s1917_s25  }
  0x40   : > { %s2121_s12 = sshll.u32 %s329_s19, 7  ;;  %s328_s20 = scalar_lea.sflag [#allocation8], %s327_s0 }
  0x41   : > { %s2124_s16 = scalar_lea.vmem [#allocation7], %s2121_s12 }
  0x42   : > { %1896 = dma.done.wait (%p2010_p4), %s328_s20, 2048  }
  0x43   : > { %1898 = vsyncadd (%p2010_p4), %s328_s20, 4294965248 }
  0x44   : > { %1900 = dma.done.wait (%p89_p1), [#allocation8], 6144  }
  0x45   : > { %1902 = vsyncadd (%p89_p1), [#allocation8], 4294961152 }
  0x46   : > { %1904 = dma.done.wait (%p89_p1), [#allocation11], 6192  }
  0x47   : > { %1906 = vsyncadd (%p89_p1), [#allocation11], 4294961104 }
  0x48   : > { %352 = sfence }
  0x49   : > { %v2139_v0 = vld [vmem:[%s2124_s16 + $0x78] sm:$0xff]  ;;  %v2142_v1 = vld [vmem:[%s2124_s16 + $0x70] sm:$0xff]  ;;  %v2147_v2 = vld [vmem:[%s2124_s16 + $0x68] sm:$0xff]  ;;  %s492_s30 = sld [smem:[#allocation2]] }
  0x4a   : > { %427 = vmatpush.msra.mxu0 %v2139_v0  ;;  %1519 = vmatpush.msra.mxu1 %v2139_v0  ;;  %v2154_v3 = vld [vmem:[%s2124_s16 + $0x60] sm:$0xff]  ;;  %v2160_v4 = vld [vmem:[%s2124_s16 + $0x58] sm:$0xff]  ;;  %v2168_v5 = vld [vmem:[%s2124_s16 + $0x50] sm:$0xff]  ;;  %s1469_s29 = sld [smem:[#allocation2 + $0x1]] }
  0x4b   : > { %1520 = vmatpush.msra.mxu2 %v2139_v0  ;;  %1521 = vmatpush.msra.mxu3 %v2139_v0  ;;  %v2175_v6 = vld [vmem:[%s2124_s16 + $0x48] sm:$0xff]  ;;  %v2182_v7 = vld [vmem:[%s2124_s16 + $0x40] sm:$0xff]  ;;  %v2189_v8 = vld [vmem:[%s2124_s16 + $0x38] sm:$0xff]  ;;  %s1471_s15 = sld [smem:[#allocation2 + $0x2]] }
  0x4c   : > { %428 = vmatpush.msra.mxu0 %v2142_v1  ;;  %1522 = vmatpush.msra.mxu1 %v2142_v1  ;;  %v2196_v9 = vld [vmem:[%s2124_s16 + $0x30] sm:$0xff]  ;;  %v2203_v10 = vld [vmem:[%s2124_s16 + $0x28] sm:$0xff]  ;;  %v2210_v11 = vld [vmem:[%s2124_s16 + $0x20] sm:$0xff] }
  0x4d   : > { %1523 = vmatpush.msra.mxu2 %v2142_v1  ;;  %1524 = vmatpush.msra.mxu3 %v2142_v1  ;;  %v2217_v12 = vld [vmem:[%s2124_s16 + $0x18] sm:$0xff]  ;;  %v2224_v13 = vld [vmem:[%s2124_s16 + $0x10] sm:$0xff]  ;;  %v1481_v14 = vld [vmem:[#allocation6] sm:$0xff]  }
  0x4e   : > { %429 = vmatpush.msra.mxu0 %v2147_v2  ;;  %1525 = vmatpush.msra.mxu1 %v2147_v2  ;;  %v1513_v15 = vld [vmem:[#allocation6 + $0x10] sm:$0xff]   ;;  %v2231_v16 = vld [vmem:[%s2124_s16 + $0x8] sm:$0xff]  ;;  %v1515_v17 = vld [vmem:[#allocation6 + $0x20] sm:$0xff]   ;;  %v2240_v20 = vunpack.c.l.bf16 %v1481_v14  ;;  %v2262_v26 = vunpack.c.h.bf16 %v1481_v14 }
  0x4f   : > { %1526 = vmatpush.msra.mxu2 %v2147_v2  ;;  %1527 = vmatpush.msra.mxu3 %v2147_v2  ;;  %v1517_v18 = vld [vmem:[#allocation6 + $0x30] sm:$0xff]   ;;  %v2238_v19 = vld [vmem:[%s2124_s16] sm:$0xff]  ;;  %v2242_v21 = vunpack.c.l.bf16 %v1513_v15  ;;  %v2249_v22 = vunpack.c.l.bf16 %v1515_v17  ;;  %v542_v24 = vld [vmem:[#allocation9 + $0x78] sm:$0xff]  ;;  %v2264_v27 = vunpack.c.h.bf16 %v1513_v15  ;;  %v2266_v29 = vunpack.c.h.bf16 %v1515_v17  ;;  %s493_s14 = sadd.f32 1.0, %s492_s30  ;;  %s2522_s16 = scalar_lea.vmem [#allocation13], %s2121_s12 }
  0x50   : > { %430 = vmatpush.msra.mxu0 %v2154_v3  ;;  %1528 = vmatpush.msra.mxu1 %v2154_v3  ;;  %v2252_v23 = vunpack.c.l.bf16 %v1517_v18  ;;  %v541_v25 = vld [vmem:[#allocation9 + $0x70] sm:$0xff]  ;;  %v540_v28 = vld [vmem:[#allocation9 + $0x68] sm:$0xff]  ;;  %v2268_v30 = vunpack.c.h.bf16 %v1517_v18  ;;  %v539_v31 = vld [vmem:[#allocation9 + $0x60] sm:$0xff]  ;;  %s779_s9 = sadd.f32 1.0, %s1469_s29  ;;  %s1479_s12 = sshll.u32 %s2001_s28, 7 }
  0x51   : > { %1529 = vmatpush.msra.mxu2 %v2154_v3  ;;  %1530 = vmatpush.msra.mxu3 %v2154_v3  ;;  %v538_v32 = vld [vmem:[#allocation9 + $0x58] sm:$0xff]  ;;  %v1512_v33 = vld [vmem:[#allocation6 + $0x8] sm:$0xff]   ;;  %v537_v35 = vld [vmem:[#allocation9 + $0x50] sm:$0xff]  ;;  %v2298_v56 = vstv %s493_s14  ;;  %s1069_s17 = sadd.f32 1.0, %s1471_s15  ;;  %s1321_s22 = scalar_lea.hbm %s2581_s7, %s1479_s12 }
  0x52   : > { %431 = vmatpush.msra.mxu0 %v2160_v4  ;;  %1531 = vmatpush.msra.mxu1 %v2160_v4  ;;  %v1514_v34 = vld [vmem:[#allocation6 + $0x18] sm:$0xff]   ;;  %v1516_v36 = vld [vmem:[#allocation6 + $0x28] sm:$0xff]   ;;  %v2274_v38 = vunpack.c.l.bf16 %v1512_v33  ;;  %v535_v43 = vld [vmem:[#allocation9 + $0x40] sm:$0xff]  ;;  %v2286_v46 = vunpack.c.h.bf16 %v1512_v33  ;;  %v495_v57 = vmul.f32 %v2298_v56, %v2238_v19  ;;  %v496_v60 = vmul.f32 %v2298_v56, %v2231_v16  ;;  %s1322_s23 = sshll.u32 %s2522_s16, 4  ;;  %s1324_s29 = sshll.u32 %s1321_s22, 4  ;;  %s1323_s23 = int_to_ptr.vmem [resolvable:$true] %s1322_s23  ;;  %s1325_s29 = int_to_ptr.hbm [resolvable:$true] %s1324_s29 }
  0x53   : > { %1532 = vmatpush.msra.mxu2 %v2160_v4  ;;  %1533 = vmatpush.msra.mxu3 %v2160_v4  ;;  %v1518_v37 = vld [vmem:[#allocation6 + $0x38] sm:$0xff]   ;;  %v2276_v39 = vunpack.c.l.bf16 %v1514_v34  ;;  %v536_v40 = vld [vmem:[#allocation9 + $0x48] sm:$0xff]  ;;  %v2278_v41 = vunpack.c.l.bf16 %v1516_v36  ;;  %v533_v45 = vld [vmem:[#allocation9 + $0x30] sm:$0xff]  ;;  %v2288_v47 = vunpack.c.h.bf16 %v1514_v34  ;;  %v2290_v49 = vunpack.c.h.bf16 %v1516_v36  ;;  %s1857_s10 = sshra.s32 %s1325_s29, 4  ;;  %s1858_s10 = int_to_ptr.hbm [resolvable:$true] %s1857_s10 }
  0x54   : > { %432 = vmatpush.msra.mxu0 %v2168_v5  ;;  %1534 = vmatpush.msra.mxu1 %v2168_v5  ;;  %v2280_v42 = vunpack.c.l.bf16 %v1518_v37  ;;  %v534_v44 = vld [vmem:[#allocation9 + $0x38] sm:$0xff]  ;;  %v532_v48 = vld [vmem:[#allocation9 + $0x28] sm:$0xff]  ;;  %v2292_v50 = vunpack.c.h.bf16 %v1518_v37  ;;  %v531_v51 = vld [vmem:[#allocation9 + $0x20] sm:$0xff]  ;;  %v497_v63 = vmul.f32 %v2298_v56, %v2224_v13  ;;  %v498_v17 = vmul.f32 %v2298_v56, %v2217_v12  ;;  %s1859_s28 = scalar_lea.hbm %s1858_s10, 128  ;;  %p1864_p7 = scmp.lt.s32.totalorder %s1858_s10, %s2581_s7 }
  0x55   : > { %1535 = vmatpush.msra.mxu2 %v2168_v5  ;;  %1536 = vmatpush.msra.mxu3 %v2168_v5  ;;  %v530_v52 = vld [vmem:[#allocation9 + $0x18] sm:$0xff]  ;;  %v529_v53 = vld [vmem:[#allocation9 + $0x10] sm:$0xff]  ;;  %v528_v54 = vld [vmem:[#allocation9 + $0x8] sm:$0xff]  ;;  %v501_v33 = vmul.f32 %v2298_v56, %v2196_v9  ;;  %v502_v34 = vmul.f32 %v2298_v56, %v2189_v8  ;;  %v503_v37 = vmul.f32 %v2298_v56, %v2182_v7  ;;  %p1860_p1 = scmp.ne.s32.totalorder %s1858_s10, %s1859_s28 }
  0x56   : > { %433 = vmatpush.msra.mxu0 %v2175_v6  ;;  %1537 = vmatpush.msra.mxu1 %v2175_v6  ;;  %v527_v55 = vld [vmem:[#allocation9] sm:$0xff] }
  0x57   : > { %1538 = vmatpush.msra.mxu2 %v2175_v6  ;;  %1539 = vmatpush.msra.mxu3 %v2175_v6  ;;  %p1861_p4 = pnand %p1860_p1, %p2078_p5 }
  0x58   : > { %434 = vmatpush.msra.mxu0 %v2182_v7  ;;  %1540 = vmatpush.msra.mxu1 %v2182_v7 }
  0x59   : > { %1541 = vmatpush.msra.mxu2 %v2182_v7  ;;  %1542 = vmatpush.msra.mxu3 %v2182_v7  ;;  %v639_v7 = vld [vmem:[#allocation10 + $0x58] sm:$0xff]  ;;  %p1862_p8 = pneg %p1861_p4 }
  0x5a   : > { %435 = vmatpush.msra.mxu0 %v2189_v8  ;;  %1543 = vmatpush.msra.mxu1 %v2189_v8 }
  0x5b   : > { %1544 = vmatpush.msra.mxu2 %v2189_v8  ;;  %1545 = vmatpush.msra.mxu3 %v2189_v8 }
  0x5c   : > { %436 = vmatpush.msra.mxu0 %v2196_v9  ;;  %1546 = vmatpush.msra.mxu1 %v2196_v9 }
  0x5d   : > { %1547 = vmatpush.msra.mxu2 %v2196_v9  ;;  %1548 = vmatpush.msra.mxu3 %v2196_v9  ;;  %v642_v9 = vld [vmem:[#allocation10 + $0x70] sm:$0xff] }
  0x5e   : > { %437 = vmatpush.msra.mxu0 %v2203_v10  ;;  %1549 = vmatpush.msra.mxu1 %v2203_v10 }
  0x5f   : > { %1550 = vmatpush.msra.mxu2 %v2203_v10  ;;  %1551 = vmatpush.msra.mxu3 %v2203_v10 }
  0x60   : > { %438 = vmatpush.msra.mxu0 %v2210_v11  ;;  %1552 = vmatpush.msra.mxu1 %v2210_v11 }
  0x61   : > { %1553 = vmatpush.msra.mxu2 %v2210_v11  ;;  %1554 = vmatpush.msra.mxu3 %v2210_v11 }
  0x62   : > { %439 = vmatpush.msra.mxu0 %v2217_v12  ;;  %1555 = vmatpush.msra.mxu1 %v2217_v12 }
  0x63   : > { %1556 = vmatpush.msra.mxu2 %v2217_v12  ;;  %1557 = vmatpush.msra.mxu3 %v2217_v12 }
  0x64   : > { %440 = vmatpush.msra.mxu0 %v2224_v13  ;;  %1558 = vmatpush.msra.mxu1 %v2224_v13 }
  0x65   : > { %1559 = vmatpush.msra.mxu2 %v2224_v13  ;;  %1560 = vmatpush.msra.mxu3 %v2224_v13 }
  0x66   : > { %441 = vmatpush.msra.mxu0 %v2231_v16  ;;  %1561 = vmatpush.msra.mxu1 %v2231_v16 }
  0x67   : > { %1562 = vmatpush.msra.mxu2 %v2231_v16  ;;  %1563 = vmatpush.msra.mxu3 %v2231_v16 }
  0x68   : > { %442 = vmatpush.msra.mxu0 %v2238_v19  ;;  %1564 = vmatpush.msra.mxu1 %v2238_v19 }
  0x69   : > { %443 = vmatmul.f32.vlgmr.msra.gmra.mxu0 %v2240_v20  ;;  %455 = vmatmul.f32.vlgmr.msra.gmra.mxu1 %v2242_v21 }
  0x6a   : > { %1565 = vmatpush.msra.mxu2 %v2238_v19  ;;  %1566 = vmatpush.msra.mxu3 %v2238_v19 }
  0x6b   : > { %467 = vmatmul.f32.vlgmr.msra.gmra.mxu2 %v2249_v22  ;;  %479 = vmatmul.f32.vlgmr.msra.gmra.mxu3 %v2252_v23 }
  0x6c   : > { %547 = vmatpush.msrb.mxu1 %v542_v24 }
  0x6e   : > { %548 = vmatpush.msrb.mxu1 %v541_v25  ;;  %v499_v25 = vmul.f32 %v2298_v56, %v2210_v11 }
  0x70   : > { %549 = vmatpush.msrb.mxu1 %v540_v28 }
  0x71   : > { %446 = vmatmul.f32.gmra.mxu0 %v2262_v26  ;;  %458 = vmatmul.f32.gmra.mxu1 %v2264_v27 }
  0x72   : > { %550 = vmatpush.msrb.mxu1 %v539_v31  ;;  %v500_v31 = vmul.f32 %v2298_v56, %v2203_v10 }
  0x73   : > { %470 = vmatmul.f32.gmra.mxu2 %v2266_v29  ;;  %482 = vmatmul.f32.gmra.mxu3 %v2268_v30 }
  0x74   : > { %551 = vmatpush.msrb.mxu1 %v538_v32 }
  0x76   : > { %552 = vmatpush.msrb.mxu1 %v537_v35 }
  0x78   : > { %553 = vmatpush.msrb.mxu1 %v536_v40 }
  0x79   : > { %449 = vmatmul.f32.gmra.mxu0 %v2274_v38  ;;  %461 = vmatmul.f32.gmra.mxu1 %v2276_v39 }
  0x7a   : > { %554 = vmatpush.msrb.mxu1 %v535_v43  ;;  %v504_v43 = vmul.f32 %v2298_v56, %v2175_v6  ;;  %v506_v6 = vmul.f32 %v2298_v56, %v2160_v4 }
  0x7b   : > { %473 = vmatmul.f32.gmra.mxu2 %v2278_v41  ;;  %485 = vmatmul.f32.gmra.mxu3 %v2280_v42 }
  0x7c   : > { %555 = vmatpush.msrb.mxu1 %v534_v44  ;;  %v643_v44 = vld [vmem:[#allocation10 + $0x78] sm:$0xff] }
  0x7d   : > { %648 = vmatpush.msrb.mxu2 %v643_v44 }
  0x7e   : > { %556 = vmatpush.msrb.mxu1 %v533_v45  ;;  %v641_v45 = vld [vmem:[#allocation10 + $0x68] sm:$0xff] }
  0x7f   : > { %649 = vmatpush.msrb.mxu2 %v642_v9 }
  0x80   : > { %557 = vmatpush.msrb.mxu1 %v532_v48 }
  0x81   : > { %452 = vmatmul.f32.gmra.mxu0 %v2286_v46  ;;  %464 = vmatmul.f32.gmra.mxu1 %v2288_v47 }
  0x82   : > { %558 = vmatpush.msrb.mxu1 %v531_v51  ;;  %650 = vmatpush.msrb.mxu2 %v641_v45  ;;  %v505_v51 = vmul.f32 %v2298_v56, %v2168_v5 }
  0x83   : > { %476 = vmatmul.f32.gmra.mxu2 %v2290_v49  ;;  %488 = vmatmul.f32.gmra.mxu3 %v2292_v50 }
  0x84   : > { %559 = vmatpush.msrb.mxu1 %v530_v52  ;;  %v640_v52 = vld [vmem:[#allocation10 + $0x60] sm:$0xff] }
  0x85   : > { %651 = vmatpush.msrb.mxu2 %v640_v52 }
  0x86   : > { %560 = vmatpush.msrb.mxu1 %v529_v53  ;;  %v638_v53 = vld [vmem:[#allocation10 + $0x50] sm:$0xff] }
  0x87   : > { %652 = vmatpush.msrb.mxu2 %v639_v7 }
  0x88   : > { %561 = vmatpush.msrb.mxu1 %v528_v54 }
  0x89   : > { %653 = vmatpush.msrb.mxu2 %v638_v53 }
  0x8a   : > { %562 = vmatpush.msrb.mxu1 %v527_v55  ;;  %v637_v55 = vld [vmem:[#allocation10 + $0x48] sm:$0xff] }
  0x8b   : > { %654 = vmatpush.msrb.mxu2 %v637_v55 }
  0xe6   : > { %v444_v58 = vpop.f32.mrf.mxu0  ;;  %v456_v18 = vpop.f32.mrf.mxu1 }
  0xe7   : > { %v511_v59 = vadd.f32 %v495_v57, %v444_v58  ;;  %v515_v16 = vadd.f32 %v499_v25, %v456_v18  ;;  %v636_v57 = vld [vmem:[#allocation10 + $0x40] sm:$0xff]  ;;  %v635_v58 = vld [vmem:[#allocation10 + $0x38] sm:$0xff] }
  0xe8   : > { %655 = vmatpush.msrb.mxu2 %v636_v57  ;;  %v628_v25 = vld [vmem:[#allocation10] sm:$0xff] }
  0xe9   : > { %563 = vmatmul.f32.vlgmr.msrb.gmra.mxu1 %v511_v59 }
  0xea   : > { %656 = vmatpush.msrb.mxu2 %v635_v58 }
  0xee   : > { %v447_v61 = vpop.f32.mrf.mxu0  ;;  %v459_v28 = vpop.f32.mrf.mxu1 }
  0xef   : > { %v512_v62 = vadd.f32 %v496_v60, %v447_v61  ;;  %v516_v13 = vadd.f32 %v500_v31, %v459_v28  ;;  %v468_v36 = vpop.f32.mrf.mxu2  ;;  %v634_v60 = vld [vmem:[#allocation10 + $0x30] sm:$0xff]  ;;  %v480_v61 = vpop.f32.mrf.mxu3 }
  0xf0   : > { %v519_v40 = vadd.f32 %v503_v37, %v468_v36  ;;  %657 = vmatpush.msrb.mxu2 %v634_v60 }
  0xf1   : > { %566 = vmatmul.f32.gmra.mxu1 %v512_v62  ;;  %v633_v62 = vld [vmem:[#allocation10 + $0x28] sm:$0xff] }
  0xf2   : > { %658 = vmatpush.msrb.mxu2 %v633_v62 }
  0xf6   : > { %v450_v14 = vpop.f32.mrf.mxu0  ;;  %v462_v32 = vpop.f32.mrf.mxu1 }
  0xf7   : > { %v513_v15 = vadd.f32 %v497_v63, %v450_v14  ;;  %v517_v12 = vadd.f32 %v501_v33, %v462_v32  ;;  %v471_v10 = vpop.f32.mrf.mxu2  ;;  %v507_v63 = vmul.f32 %v2298_v56, %v2154_v3  ;;  %v632_v14 = vld [vmem:[#allocation10 + $0x20] sm:$0xff]  ;;  %v483_v18 = vpop.f32.mrf.mxu3  ;;  %v509_v3 = vmul.f32 %v2298_v56, %v2142_v1 }
  0xf8   : > { %v520_v48 = vadd.f32 %v504_v43, %v471_v10  ;;  %659 = vmatpush.msrb.mxu2 %v632_v14 }
  0xf9   : > { %569 = vmatmul.f32.gmra.mxu1 %v513_v15  ;;  %v631_v15 = vld [vmem:[#allocation10 + $0x18] sm:$0xff]  ;;  %v523_v4 = vadd.f32 %v507_v63, %v480_v61 }
  0xfa   : > { %660 = vmatpush.msrb.mxu2 %v631_v15 }
  0xfe   : > { %v453_v19 = vpop.f32.mrf.mxu0  ;;  %v465_v35 = vpop.f32.mrf.mxu1 }
  0xff   : > { %v514_v24 = vadd.f32 %v498_v17, %v453_v19  ;;  %v518_v11 = vadd.f32 %v502_v34, %v465_v35  ;;  %v474_v8 = vpop.f32.mrf.mxu2  ;;  %v630_v17 = vld [vmem:[#allocation10 + $0x10] sm:$0xff]  ;;  %v629_v19 = vld [vmem:[#allocation10 + $0x8] sm:$0xff]  ;;  %v486_v28 = vpop.f32.mrf.mxu3 }
 0x100   : > { %v521_v54 = vadd.f32 %v505_v51, %v474_v8  ;;  %661 = vmatpush.msrb.mxu2 %v630_v17  ;;  %v525_v31 = vadd.f32 %v509_v3, %v486_v28 }
 0x101   : > { %572 = vmatmul.f32.gmra.mxu1 %v514_v24  ;;  %v508_v24 = vmul.f32 %v2298_v56, %v2147_v2  ;;  %v1672_v2 = vld [vmem:[%s2578_s4] ss:$0 sm:$0xff] }
 0x102   : > { %662 = vmatpush.msrb.mxu2 %v629_v19 }
 0x104   : > { %663 = vmatpush.msrb.mxu2 %v628_v25 }
 0x107   : > { %v477_v59 = vpop.f32.mrf.mxu2  ;;  %v489_v32 = vpop.f32.mrf.mxu3 }
 0x108   : > { %v522_v5 = vadd.f32 %v506_v6, %v477_v59 }
 0x109   : > { %575 = vmatmul.f32.gmra.mxu1 %v515_v16  ;;  %v524_v16 = vadd.f32 %v508_v24, %v483_v18 }
 0x111   : > { %578 = vmatmul.f32.gmra.mxu1 %v516_v13  ;;  %v510_v13 = vmul.f32 %v2298_v56, %v2139_v0 }
 0x113   : > { %v526_v33 = vadd.f32 %v510_v13, %v489_v32 }
 0x119   : > { %581 = vmatmul.f32.gmra.mxu1 %v517_v12 }
 0x121   : > { %584 = vmatmul.f32.gmra.mxu1 %v518_v11 }
 0x129   : > { %587 = vmatmul.f32.gmra.mxu1 %v519_v40 }
 0x131   : > { %590 = vmatmul.f32.gmra.mxu1 %v520_v48 }
 0x139   : > { %593 = vmatmul.f32.gmra.mxu1 %v521_v54 }
 0x141   : > { %596 = vmatmul.f32.gmra.mxu1 %v522_v5 }
 0x149   : > { %599 = vmatmul.f32.gmra.mxu1 %v523_v4 }
 0x151   : > { %602 = vmatmul.f32.gmra.mxu1 %v524_v16 }
 0x159   : > { %605 = vmatmul.f32.gmra.mxu1 %v525_v31 }
 0x161   : > { %608 = vmatmul.f32.gmra.mxu1 %v526_v33 }
 0x166   : > { %v564_v12 = vpop.f32.mrf.mxu1 }
 0x167   : > { %v565_v34 = vadd.f32 %v1672_v2, %v564_v12 }
 0x169   : > { %v612_v35 = vmax.f32 %v565_v34, 0.0 }
 0x16b   : > { %664 = vmatmul.f32.vlgmr.msrb.gmra.mxu2 %v612_v35 }
 0x16e   : > { %v567_v36 = vpop.f32.mrf.mxu1 }
 0x16f   : > { %v568_v11 = vadd.f32 %v1672_v2, %v567_v36 }
 0x171   : > { %v613_v37 = vmax.f32 %v568_v11, 0.0 }
 0x173   : > { %667 = vmatmul.f32.gmra.mxu2 %v613_v37 }
 0x176   : > { %v570_v1 = vpop.f32.mrf.mxu1 }
 0x177   : > { %v571_v40 = vadd.f32 %v1672_v2, %v570_v1 }
 0x179   : > { %v614_v10 = vmax.f32 %v571_v40, 0.0 }
 0x17b   : > { %670 = vmatmul.f32.gmra.mxu2 %v614_v10 }
 0x17e   : > { %v573_v0 = vpop.f32.mrf.mxu1 }
 0x17f   : > { %v574_v56 = vadd.f32 %v1672_v2, %v573_v0 }
 0x181   : > { %v615_v43 = vmax.f32 %v574_v56, 0.0 }
 0x183   : > { %673 = vmatmul.f32.gmra.mxu2 %v615_v43 }
 0x186   : > { %v576_v44 = vpop.f32.mrf.mxu1 }
 0x187   : > { %v577_v9 = vadd.f32 %v1672_v2, %v576_v44 }
 0x189   : > { %v616_v45 = vmax.f32 %v577_v9, 0.0 }
 0x18b   : > { %676 = vmatmul.f32.gmra.mxu2 %v616_v45 }
 0x18e   : > { %v579_v48 = vpop.f32.mrf.mxu1 }
 0x18f   : > { %v580_v8 = vadd.f32 %v1672_v2, %v579_v48 }
 0x191   : > { %v617_v51 = vmax.f32 %v580_v8, 0.0  ;;  %v1673_v8 = vld [vmem:[#allocation12] ss:$0 sm:$0xff] }
 0x193   : > { %679 = vmatmul.f32.gmra.mxu2 %v617_v51 }
 0x196   : > { %v582_v52 = vpop.f32.mrf.mxu1 }
 0x197   : > { %v583_v7 = vadd.f32 %v1672_v2, %v582_v52 }
 0x199   : > { %v618_v53 = vmax.f32 %v583_v7, 0.0 }
 0x19b   : > { %682 = vmatmul.f32.gmra.mxu2 %v618_v53 }
 0x19e   : > { %v585_v54 = vpop.f32.mrf.mxu1 }
 0x19f   : > { %v586_v55 = vadd.f32 %v1672_v2, %v585_v54 }
 0x1a1   : > { %v619_v6 = vmax.f32 %v586_v55, 0.0 }
 0x1a3   : > { %685 = vmatmul.f32.gmra.mxu2 %v619_v6 }
 0x1a6   : > { %v588_v57 = vpop.f32.mrf.mxu1 }
 0x1a7   : > { %v589_v58 = vadd.f32 %v1672_v2, %v588_v57 }
 0x1a9   : > { %v620_v59 = vmax.f32 %v589_v58, 0.0 }
 0x1ab   : > { %688 = vmatmul.f32.gmra.mxu2 %v620_v59 }
 0x1ae   : > { %v591_v60 = vpop.f32.mrf.mxu1 }
 0x1af   : > { %v592_v61 = vadd.f32 %v1672_v2, %v591_v60 }
 0x1b1   : > { %v621_v5 = vmax.f32 %v592_v61, 0.0 }
 0x1b3   : > { %691 = vmatmul.f32.gmra.mxu2 %v621_v5 }
 0x1b6   : > { %v594_v62 = vpop.f32.mrf.mxu1 }
 0x1b7   : > { %v595_v63 = vadd.f32 %v1672_v2, %v594_v62 }
 0x1b9   : > { %v622_v14 = vmax.f32 %v595_v63, 0.0 }
 0x1bb   : > { %694 = vmatmul.f32.gmra.mxu2 %v622_v14 }
 0x1be   : > { %v597_v15 = vpop.f32.mrf.mxu1 }
 0x1bf   : > { %v598_v4 = vadd.f32 %v1672_v2, %v597_v15  ;;  %v829_v15 = vld [vmem:[#allocation9 + $0xf8] sm:$0xff] }
 0x1c0   : > { %835 = vmatpush.msrb.mxu0 %v829_v15 }
 0x1c1   : > { %v623_v17 = vmax.f32 %v598_v4, 0.0  ;;  %v828_v4 = vld [vmem:[#allocation9 + $0xf0] sm:$0xff] }
 0x1c2   : > { %836 = vmatpush.msrb.mxu0 %v828_v4 }
 0x1c3   : > { %697 = vmatmul.f32.gmra.mxu2 %v623_v17  ;;  %v827_v17 = vld [vmem:[#allocation9 + $0xe8] sm:$0xff] }
 0x1c4   : > { %837 = vmatpush.msrb.mxu0 %v827_v17 }
 0x1c6   : > { %v600_v18 = vpop.f32.mrf.mxu1 }
 0x1c7   : > { %v601_v19 = vadd.f32 %v1672_v2, %v600_v18  ;;  %v826_v18 = vld [vmem:[#allocation9 + $0xe0] sm:$0xff] }
 0x1c8   : > { %838 = vmatpush.msrb.mxu0 %v826_v18 }
 0x1c9   : > { %v624_v24 = vmax.f32 %v601_v19, 0.0  ;;  %v825_v19 = vld [vmem:[#allocation9 + $0xd8] sm:$0xff] }
 0x1ca   : > { %839 = vmatpush.msrb.mxu0 %v825_v19 }
 0x1cb   : > { %700 = vmatmul.f32.gmra.mxu2 %v624_v24  ;;  %v824_v24 = vld [vmem:[#allocation9 + $0xd0] sm:$0xff] }
 0x1cc   : > { %840 = vmatpush.msrb.mxu0 %v824_v24 }
 0x1ce   : > { %v603_v25 = vpop.f32.mrf.mxu1 }
 0x1cf   : > { %v604_v16 = vadd.f32 %v1672_v2, %v603_v25  ;;  %v823_v25 = vld [vmem:[#allocation9 + $0xc8] sm:$0xff] }
 0x1d0   : > { %841 = vmatpush.msrb.mxu0 %v823_v25  ;;  %v932_v25 = vld [vmem:[#allocation10 + $0xf8] sm:$0xff] }
 0x1d1   : > { %v625_v28 = vmax.f32 %v604_v16, 0.0  ;;  %v822_v16 = vld [vmem:[#allocation9 + $0xc0] sm:$0xff]  ;;  %938 = vmatpush.msra.mxu1 %v932_v25 }
 0x1d2   : > { %842 = vmatpush.msrb.mxu0 %v822_v16  ;;  %v931_v16 = vld [vmem:[#allocation10 + $0xf0] sm:$0xff] }
 0x1d3   : > { %703 = vmatmul.f32.gmra.mxu2 %v625_v28  ;;  %v821_v28 = vld [vmem:[#allocation9 + $0xb8] sm:$0xff]  ;;  %939 = vmatpush.msra.mxu1 %v931_v16 }
 0x1d4   : > { %843 = vmatpush.msrb.mxu0 %v821_v28 }
 0x1d6   : > { %v606_v3 = vpop.f32.mrf.mxu1 }
 0x1d7   : > { %v607_v31 = vadd.f32 %v1672_v2, %v606_v3  ;;  %v820_v3 = vld [vmem:[#allocation9 + $0xb0] sm:$0xff] }
 0x1d8   : > { %844 = vmatpush.msrb.mxu0 %v820_v3 }
 0x1d9   : > { %v626_v13 = vmax.f32 %v607_v31, 0.0  ;;  %v819_v31 = vld [vmem:[#allocation9 + $0xa8] sm:$0xff] }
 0x1da   : > { %845 = vmatpush.msrb.mxu0 %v819_v31  ;;  %v930_v31 = vld [vmem:[#allocation10 + $0xe8] sm:$0xff] }
 0x1db   : > { %706 = vmatmul.f32.gmra.mxu2 %v626_v13  ;;  %v818_v13 = vld [vmem:[#allocation9 + $0xa0] sm:$0xff]  ;;  %940 = vmatpush.msra.mxu1 %v930_v31 }
 0x1dc   : > { %846 = vmatpush.msrb.mxu0 %v818_v13  ;;  %v928_v13 = vld [vmem:[#allocation10 + $0xd8] sm:$0xff] }
 0x1de   : > { %v609_v32 = vpop.f32.mrf.mxu1 }
 0x1df   : > { %v610_v33 = vadd.f32 %v1672_v2, %v609_v32  ;;  %v817_v32 = vld [vmem:[#allocation9 + $0x98] sm:$0xff] }
 0x1e0   : > { %847 = vmatpush.msrb.mxu0 %v817_v32  ;;  %v927_v32 = vld [vmem:[#allocation10 + $0xd0] sm:$0xff] }
 0x1e1   : > { %v627_v12 = vmax.f32 %v610_v33, 0.0  ;;  %v816_v33 = vld [vmem:[#allocation9 + $0x90] sm:$0xff] }
 0x1e2   : > { %848 = vmatpush.msrb.mxu0 %v816_v33 }
 0x1e3   : > { %709 = vmatmul.f32.gmra.mxu2 %v627_v12  ;;  %v815_v12 = vld [vmem:[#allocation9 + $0x88] sm:$0xff] }
 0x1e4   : > { %849 = vmatpush.msrb.mxu0 %v815_v12 }
 0x1ee   : > { %v665_v34 = vpop.f32.mrf.mxu2 }
 0x1ef   : > { %v666_v14 = vadd.f32 %v1673_v8, %v665_v34  ;;  %v814_v34 = vld [vmem:[#allocation9 + $0x80] sm:$0xff] }
 0x1f0   : > { %850 = vmatpush.msrb.mxu0 %v814_v34  ;;  %v926_v34 = vld [vmem:[#allocation10 + $0xc8] sm:$0xff] }
 0x1f6   : > { %v668_v35 = vpop.f32.mrf.mxu2 }
 0x1f7   : > { %v669_v63 = vadd.f32 %v1673_v8, %v668_v35  ;;  %v2393_v35 = vstv %s779_s9  ;;  %s1310_s9 = scalar_lea.sflag [#allocation4], %s329_s19 }
 0x1fe   : > { %v671_v36 = vpop.f32.mrf.mxu2 }
 0x1ff   : > { %v2374_v62 = vadd.f32 %v1673_v8, %v671_v36  ;;  %v781_v36 = vmul.f32 %v2393_v35, %v666_v14 }
 0x206   : > { %v674_v11 = vpop.f32.mrf.mxu2 }
 0x207   : > { %v2371_v5 = vadd.f32 %v1673_v8, %v674_v11 }
 0x20e   : > { %v677_v37 = vpop.f32.mrf.mxu2 }
 0x20f   : > { %v2368_v61 = vadd.f32 %v1673_v8, %v677_v37 }
 0x216   : > { %v680_v1 = vpop.f32.mrf.mxu2 }
 0x217   : > { %v2365_v60 = vadd.f32 %v1673_v8, %v680_v1  ;;  %v782_v1 = vmul.f32 %v2393_v35, %v669_v63 }
 0x21e   : > { %v683_v40 = vpop.f32.mrf.mxu2 }
 0x21f   : > { %v2362_v59 = vadd.f32 %v1673_v8, %v683_v40 }
 0x221   : > { %v787_v15 = vmul.f32 %v2393_v35, %v2362_v59 }
 0x226   : > { %v686_v10 = vpop.f32.mrf.mxu2 }
 0x227   : > { %v2359_v58 = vadd.f32 %v1673_v8, %v686_v10 }
 0x229   : > { %v788_v17 = vmul.f32 %v2393_v35, %v2359_v58 }
 0x22e   : > { %v689_v0 = vpop.f32.mrf.mxu2 }
 0x22f   : > { %v2355_v57 = vadd.f32 %v1673_v8, %v689_v0  ;;  %v783_v0 = vmul.f32 %v2393_v35, %v2374_v62 }
 0x231   : > { %v789_v19 = vmul.f32 %v2393_v35, %v2355_v57 }
 0x236   : > { %v692_v56 = vpop.f32.mrf.mxu2 }
 0x237   : > { %v2352_v6 = vadd.f32 %v1673_v8, %v692_v56 }
 0x23e   : > { %v695_v43 = vpop.f32.mrf.mxu2 }
 0x23f   : > { %v2349_v55 = vadd.f32 %v1673_v8, %v695_v43 }
 0x246   : > { %v698_v44 = vpop.f32.mrf.mxu2 }
 0x247   : > { %v2346_v54 = vadd.f32 %v1673_v8, %v698_v44  ;;  %v784_v44 = vmul.f32 %v2393_v35, %v2371_v5 }
 0x24e   : > { %v701_v9 = vpop.f32.mrf.mxu2 }
 0x24f   : > { %v2343_v53 = vadd.f32 %v1673_v8, %v701_v9 }
 0x256   : > { %v704_v45 = vpop.f32.mrf.mxu2 }
 0x257   : > { %v2340_v7 = vadd.f32 %v1673_v8, %v704_v45 }
 0x25e   : > { %v707_v48 = vpop.f32.mrf.mxu2 }
 0x25f   : > { %v2337_v52 = vadd.f32 %v1673_v8, %v707_v48  ;;  %v785_v48 = vmul.f32 %v2393_v35, %v2368_v61 }
 0x266   : > { %v710_v51 = vpop.f32.mrf.mxu2 }
 0x267   : > { %v2335_v2 = vadd.f32 %v1673_v8, %v710_v51 }
 0x269   : > { %713 = vmatpush.msrb.mxu3 %v2335_v2 }
 0x26b   : > { %714 = vmatpush.msrb.mxu3 %v2337_v52 }
 0x26d   : > { %715 = vmatpush.msrb.mxu3 %v2340_v7 }
 0x26f   : > { %716 = vmatpush.msrb.mxu3 %v2343_v53 }
 0x271   : > { %717 = vmatpush.msrb.mxu3 %v2346_v54 }
 0x273   : > { %718 = vmatpush.msrb.mxu3 %v2349_v55 }
 0x275   : > { %719 = vmatpush.msrb.mxu3 %v2352_v6 }
 0x277   : > { %720 = vmatpush.msrb.mxu3 %v2355_v57  ;;  %v791_v57 = vmul.f32 %v2393_v35, %v2349_v55  ;;  %v921_v55 = vld [vmem:[#allocation10 + $0xa0] sm:$0xff] }
 0x279   : > { %721 = vmatpush.msrb.mxu3 %v2359_v58  ;;  %v929_v58 = vld [vmem:[#allocation10 + $0xe0] sm:$0xff] }
 0x27a   : > { %941 = vmatpush.msra.mxu1 %v929_v58 }
 0x27b   : > { %722 = vmatpush.msrb.mxu3 %v2362_v59  ;;  %v790_v59 = vmul.f32 %v2393_v35, %v2352_v6  ;;  %v925_v6 = vld [vmem:[#allocation10 + $0xc0] sm:$0xff] }
 0x27c   : > { %942 = vmatpush.msra.mxu1 %v928_v13 }
 0x27d   : > { %723 = vmatpush.msrb.mxu3 %v2365_v60 }
 0x27e   : > { %943 = vmatpush.msra.mxu1 %v927_v32 }
 0x27f   : > { %724 = vmatpush.msrb.mxu3 %v2368_v61 }
 0x280   : > { %944 = vmatpush.msra.mxu1 %v926_v34 }
 0x281   : > { %725 = vmatpush.msrb.mxu3 %v2371_v5 }
 0x282   : > { %945 = vmatpush.msra.mxu1 %v925_v6 }
 0x283   : > { %726 = vmatpush.msrb.mxu3 %v2374_v62 }
 0x285   : > { %727 = vmatpush.msrb.mxu3 %v669_v63  ;;  %v786_v63 = vmul.f32 %v2393_v35, %v2365_v60 }
 0x287   : > { %728 = vmatpush.msrb.mxu3 %v666_v14 }
 0x288   : > { %729 = vmatmul.f32.vlgmr.msrb.gmra.mxu3 %v2240_v20 }
 0x290   : > { %732 = vmatmul.f32.gmra.mxu3 %v2262_v26 }
 0x298   : > { %735 = vmatmul.f32.gmra.mxu3 %v2274_v38 }
 0x2a0   : > { %738 = vmatmul.f32.gmra.mxu3 %v2286_v46 }
 0x2a8   : > { %741 = vmatmul.f32.gmra.mxu3 %v2242_v21 }
 0x2b0   : > { %744 = vmatmul.f32.gmra.mxu3 %v2264_v27 }
 0x2b8   : > { %747 = vmatmul.f32.gmra.mxu3 %v2276_v39 }
 0x2c0   : > { %750 = vmatmul.f32.gmra.mxu3 %v2288_v47 }
 0x2c8   : > { %753 = vmatmul.f32.gmra.mxu3 %v2249_v22 }
 0x2d0   : > { %756 = vmatmul.f32.gmra.mxu3 %v2266_v29 }
 0x2d8   : > { %759 = vmatmul.f32.gmra.mxu3 %v2278_v41 }
 0x2e0   : > { %762 = vmatmul.f32.gmra.mxu3 %v2290_v49 }
 0x2e8   : > { %765 = vmatmul.f32.gmra.mxu3 %v2252_v23 }
 0x2f0   : > { %768 = vmatmul.f32.gmra.mxu3 %v2268_v30 }
 0x2f8   : > { %771 = vmatmul.f32.gmra.mxu3 %v2280_v42 }
 0x300   : > { %774 = vmatmul.f32.gmra.mxu3 %v2292_v50 }
 0x30b   : > { %v730_v11 = vpop.f32.mrf.mxu3 }
 0x30c   : > { %v797_v37 = vadd.f32 %v781_v36, %v730_v11  ;;  %v924_v36 = vld [vmem:[#allocation10 + $0xb8] sm:$0xff]  ;;  %v792_v11 = vmul.f32 %v2393_v35, %v2346_v54  ;;  %v917_v54 = vld [vmem:[#allocation10 + $0x80] sm:$0xff] }
 0x30d   : > { %946 = vmatpush.msra.mxu1 %v924_v36 }
 0x30e   : > { %851 = vmatmul.f32.vlgmr.msrb.gmra.mxu0 %v797_v37  ;;  %v923_v37 = vld [vmem:[#allocation10 + $0xb0] sm:$0xff] }
 0x30f   : > { %947 = vmatpush.msra.mxu1 %v923_v37 }
 0x313   : > { %v733_v40 = vpop.f32.mrf.mxu3 }
 0x314   : > { %v798_v10 = vadd.f32 %v782_v1, %v733_v40 }
 0x316   : > { %854 = vmatmul.f32.gmra.mxu0 %v798_v10  ;;  %v922_v10 = vld [vmem:[#allocation10 + $0xa8] sm:$0xff] }
 0x317   : > { %948 = vmatpush.msra.mxu1 %v922_v10 }
 0x319   : > { %949 = vmatpush.msra.mxu1 %v921_v55 }
 0x31b   : > { %v736_v56 = vpop.f32.mrf.mxu3 }
 0x31c   : > { %v799_v43 = vadd.f32 %v783_v0, %v736_v56  ;;  %v920_v0 = vld [vmem:[#allocation10 + $0x98] sm:$0xff]  ;;  %v793_v56 = vmul.f32 %v2393_v35, %v2343_v53 }
 0x31d   : > { %950 = vmatpush.msra.mxu1 %v920_v0 }
 0x31e   : > { %857 = vmatmul.f32.gmra.mxu0 %v799_v43  ;;  %v919_v43 = vld [vmem:[#allocation10 + $0x90] sm:$0xff] }
 0x31f   : > { %951 = vmatpush.msra.mxu1 %v919_v43 }
 0x323   : > { %v739_v9 = vpop.f32.mrf.mxu3 }
 0x324   : > { %v800_v45 = vadd.f32 %v784_v44, %v739_v9 }
 0x326   : > { %860 = vmatmul.f32.gmra.mxu0 %v800_v45  ;;  %v918_v45 = vld [vmem:[#allocation10 + $0x88] sm:$0xff] }
 0x327   : > { %952 = vmatpush.msra.mxu1 %v918_v45 }
 0x329   : > { %953 = vmatpush.msra.mxu1 %v917_v54 }
 0x32b   : > { %v742_v8 = vpop.f32.mrf.mxu3 }
 0x32c   : > { %v801_v51 = vadd.f32 %v785_v48, %v742_v8  ;;  %v794_v48 = vmul.f32 %v2393_v35, %v2340_v7 }
 0x32e   : > { %863 = vmatmul.f32.gmra.mxu0 %v801_v51 }
 0x333   : > { %v745_v14 = vpop.f32.mrf.mxu3 }
 0x334   : > { %v802_v62 = vadd.f32 %v786_v63, %v745_v14  ;;  %v795_v63 = vmul.f32 %v2393_v35, %v2337_v52 }
 0x336   : > { %866 = vmatmul.f32.gmra.mxu0 %v802_v62  ;;  %v796_v62 = vmul.f32 %v2393_v35, %v2335_v2 }
 0x33b   : > { %v748_v4 = vpop.f32.mrf.mxu3 }
 0x33c   : > { %v803_v5 = vadd.f32 %v787_v15, %v748_v4 }
 0x33e   : > { %869 = vmatmul.f32.gmra.mxu0 %v803_v5  ;;  %v1674_v5 = vld [vmem:[%s2578_s4 + $0x1] ss:$0 sm:$0xff] }
 0x343   : > { %v751_v18 = vpop.f32.mrf.mxu3 }
 0x344   : > { %v804_v61 = vadd.f32 %v788_v17, %v751_v18 }
 0x346   : > { %872 = vmatmul.f32.gmra.mxu0 %v804_v61 }
 0x34b   : > { %v754_v24 = vpop.f32.mrf.mxu3 }
 0x34c   : > { %v805_v60 = vadd.f32 %v789_v19, %v754_v24 }
 0x34e   : > { %875 = vmatmul.f32.gmra.mxu0 %v805_v60 }
 0x353   : > { %v757_v28 = vpop.f32.mrf.mxu3 }
 0x354   : > { %v806_v3 = vadd.f32 %v790_v59, %v757_v28 }
 0x356   : > { %878 = vmatmul.f32.gmra.mxu0 %v806_v3 }
 0x35b   : > { %v760_v33 = vpop.f32.mrf.mxu3 }
 0x35c   : > { %v807_v12 = vadd.f32 %v791_v57, %v760_v33 }
 0x35e   : > { %881 = vmatmul.f32.gmra.mxu0 %v807_v12 }
 0x363   : > { %v763_v1 = vpop.f32.mrf.mxu3 }
 0x364   : > { %v808_v40 = vadd.f32 %v792_v11, %v763_v1 }
 0x366   : > { %884 = vmatmul.f32.gmra.mxu0 %v808_v40 }
 0x36b   : > { %v766_v44 = vpop.f32.mrf.mxu3 }
 0x36c   : > { %v809_v9 = vadd.f32 %v793_v56, %v766_v44 }
 0x36e   : > { %887 = vmatmul.f32.gmra.mxu0 %v809_v9 }
 0x373   : > { %v769_v8 = vpop.f32.mrf.mxu3 }
 0x374   : > { %v810_v51 = vadd.f32 %v794_v48, %v769_v8 }
 0x376   : > { %890 = vmatmul.f32.gmra.mxu0 %v810_v51 }
 0x37b   : > { %v772_v14 = vpop.f32.mrf.mxu3 }
 0x37c   : > { %v811_v53 = vadd.f32 %v795_v63, %v772_v14 }
 0x37e   : > { %893 = vmatmul.f32.gmra.mxu0 %v811_v53 }
 0x383   : > { %v775_v15 = vpop.f32.mrf.mxu3 }
 0x384   : > { %v812_v4 = vadd.f32 %v796_v62, %v775_v15 }
 0x386   : > { %896 = vmatmul.f32.gmra.mxu0 %v812_v4 }
 0x38b   : > { %v852_v7 = vpop.f32.mrf.mxu0 }
 0x38c   : > { %v853_v17 = vadd.f32 %v1674_v5, %v852_v7 }
 0x38e   : > { %v900_v18 = vmax.f32 %v853_v17, 0.0 }
 0x390   : > { %954 = vmatmul.f32.vlgmr.msra.gmra.mxu1 %v900_v18 }
 0x393   : > { %v855_v61 = vpop.f32.mrf.mxu0 }
 0x394   : > { %v856_v19 = vadd.f32 %v1674_v5, %v855_v61 }
 0x396   : > { %v901_v52 = vmax.f32 %v856_v19, 0.0 }
 0x398   : > { %957 = vmatmul.f32.gmra.mxu1 %v901_v52 }
 0x39b   : > { %v858_v24 = vpop.f32.mrf.mxu0 }
 0x39c   : > { %v859_v60 = vadd.f32 %v1674_v5, %v858_v24 }
 0x39e   : > { %v902_v25 = vmax.f32 %v859_v60, 0.0 }
 0x3a0   : > { %960 = vmatmul.f32.gmra.mxu1 %v902_v25 }
 0x3a3   : > { %v861_v2 = vpop.f32.mrf.mxu0 }
 0x3a4   : > { %v862_v35 = vadd.f32 %v1674_v5, %v861_v2 }
 0x3a6   : > { %v903_v59 = vmax.f32 %v862_v35, 0.0 }
 0x3a8   : > { %963 = vmatmul.f32.gmra.mxu1 %v903_v59 }
 0x3ab   : > { %v864_v16 = vpop.f32.mrf.mxu0 }
 0x3ac   : > { %v865_v28 = vadd.f32 %v1674_v5, %v864_v16 }
 0x3ae   : > { %v904_v3 = vmax.f32 %v865_v28, 0.0 }
 0x3b0   : > { %966 = vmatmul.f32.gmra.mxu1 %v904_v3 }
 0x3b3   : > { %v867_v31 = vpop.f32.mrf.mxu0 }
 0x3b4   : > { %v868_v58 = vadd.f32 %v1674_v5, %v867_v31 }
 0x3b6   : > { %v905_v13 = vmax.f32 %v868_v58, 0.0  ;;  %v1675_v58 = vld [vmem:[#allocation12 + $0x1] ss:$0 sm:$0xff] }
 0x3b8   : > { %969 = vmatmul.f32.gmra.mxu1 %v905_v13 }
 0x3bb   : > { %v870_v57 = vpop.f32.mrf.mxu0 }
 0x3bc   : > { %v871_v32 = vadd.f32 %v1674_v5, %v870_v57 }
 0x3be   : > { %v906_v33 = vmax.f32 %v871_v32, 0.0 }
 0x3c0   : > { %972 = vmatmul.f32.gmra.mxu1 %v906_v33 }
 0x3c3   : > { %v873_v12 = vpop.f32.mrf.mxu0 }
 0x3c4   : > { %v874_v34 = vadd.f32 %v1674_v5, %v873_v12 }
 0x3c6   : > { %v907_v6 = vmax.f32 %v874_v34, 0.0 }
 0x3c8   : > { %975 = vmatmul.f32.gmra.mxu1 %v907_v6 }
 0x3cb   : > { %v876_v36 = vpop.f32.mrf.mxu0 }
 0x3cc   : > { %v877_v11 = vadd.f32 %v1674_v5, %v876_v36 }
 0x3ce   : > { %v908_v37 = vmax.f32 %v877_v11, 0.0 }
 0x3d0   : > { %978 = vmatmul.f32.gmra.mxu1 %v908_v37 }
 0x3d3   : > { %v879_v1 = vpop.f32.mrf.mxu0 }
 0x3d4   : > { %v880_v40 = vadd.f32 %v1674_v5, %v879_v1 }
 0x3d6   : > { %v909_v10 = vmax.f32 %v880_v40, 0.0 }
 0x3d8   : > { %981 = vmatmul.f32.gmra.mxu1 %v909_v10 }
 0x3db   : > { %v882_v55 = vpop.f32.mrf.mxu0 }
 0x3dc   : > { %v883_v0 = vadd.f32 %v1674_v5, %v882_v55 }
 0x3de   : > { %v910_v56 = vmax.f32 %v883_v0, 0.0 }
 0x3e0   : > { %984 = vmatmul.f32.gmra.mxu1 %v910_v56 }
 0x3e3   : > { %v885_v43 = vpop.f32.mrf.mxu0 }
 0x3e4   : > { %v886_v44 = vadd.f32 %v1674_v5, %v885_v43  ;;  %v1119_v43 = vld [vmem:[#allocation9 + $0x178] sm:$0xff] }
 0x3e5   : > { %1125 = vmatpush.msra.mxu3 %v1119_v43 }
 0x3e6   : > { %v911_v9 = vmax.f32 %v886_v44, 0.0  ;;  %v1108_v44 = vld [vmem:[#allocation9 + $0x120] sm:$0xff] }
 0x3e8   : > { %987 = vmatmul.f32.gmra.mxu1 %v911_v9  ;;  %v1107_v9 = vld [vmem:[#allocation9 + $0x118] sm:$0xff] }
 0x3eb   : > { %v888_v45 = vpop.f32.mrf.mxu0 }
 0x3ec   : > { %v889_v54 = vadd.f32 %v1674_v5, %v888_v45  ;;  %v1106_v45 = vld [vmem:[#allocation9 + $0x110] sm:$0xff] }
 0x3ee   : > { %v912_v48 = vmax.f32 %v889_v54, 0.0  ;;  %v1104_v54 = vld [vmem:[#allocation9 + $0x100] sm:$0xff] }
 0x3f0   : > { %990 = vmatmul.f32.gmra.mxu1 %v912_v48 }
 0x3f3   : > { %v891_v8 = vpop.f32.mrf.mxu0 }
 0x3f4   : > { %v892_v51 = vadd.f32 %v1674_v5, %v891_v8 }
 0x3f6   : > { %v913_v63 = vmax.f32 %v892_v51, 0.0 }
 0x3f8   : > { %993 = vmatmul.f32.gmra.mxu1 %v913_v63 }
 0x3fb   : > { %v894_v14 = vpop.f32.mrf.mxu0 }
 0x3fc   : > { %v895_v53 = vadd.f32 %v1674_v5, %v894_v14 }
 0x3fe   : > { %v914_v62 = vmax.f32 %v895_v53, 0.0 }
 0x400   : > { %996 = vmatmul.f32.gmra.mxu1 %v914_v62 }
 0x403   : > { %v897_v15 = vpop.f32.mrf.mxu0 }
 0x404   : > { %v898_v4 = vadd.f32 %v1674_v5, %v897_v15 }
 0x406   : > { %v915_v7 = vmax.f32 %v898_v4, 0.0 }
 0x408   : > { %999 = vmatmul.f32.gmra.mxu1 %v915_v7 }
 0x40d   : > { %v955_v17 = vpop.f32.mrf.mxu1 }
 0x40e   : > { %v956_v56 = vadd.f32 %v1675_v58, %v955_v17 }
 0x415   : > { %v958_v18 = vpop.f32.mrf.mxu1 }
 0x416   : > { %v959_v0 = vadd.f32 %v1675_v58, %v958_v18 }
 0x41d   : > { %v961_v61 = vpop.f32.mrf.mxu1 }
 0x41e   : > { %v2466_v55 = vadd.f32 %v1675_v58, %v961_v61 }
 0x425   : > { %v964_v19 = vpop.f32.mrf.mxu1 }
 0x426   : > { %v2463_v10 = vadd.f32 %v1675_v58, %v964_v19 }
 0x42d   : > { %v967_v52 = vpop.f32.mrf.mxu1 }
 0x42e   : > { %v2460_v40 = vadd.f32 %v1675_v58, %v967_v52 }
 0x435   : > { %v970_v24 = vpop.f32.mrf.mxu1 }
 0x436   : > { %v2457_v1 = vadd.f32 %v1675_v58, %v970_v24 }
 0x43d   : > { %v973_v60 = vpop.f32.mrf.mxu1 }
 0x43e   : > { %v2454_v37 = vadd.f32 %v1675_v58, %v973_v60 }
 0x445   : > { %v976_v25 = vpop.f32.mrf.mxu1 }
 0x446   : > { %v2451_v11 = vadd.f32 %v1675_v58, %v976_v25 }
 0x44d   : > { %v979_v2 = vpop.f32.mrf.mxu1 }
 0x44e   : > { %v2448_v36 = vadd.f32 %v1675_v58, %v979_v2 }
 0x455   : > { %v982_v35 = vpop.f32.mrf.mxu1 }
 0x456   : > { %v2445_v6 = vadd.f32 %v1675_v58, %v982_v35 }
 0x45d   : > { %v985_v59 = vpop.f32.mrf.mxu1 }
 0x45e   : > { %v2442_v34 = vadd.f32 %v1675_v58, %v985_v59 }
 0x465   : > { %v988_v16 = vpop.f32.mrf.mxu1 }
 0x466   : > { %v2439_v12 = vadd.f32 %v1675_v58, %v988_v16 }
 0x46d   : > { %v991_v28 = vpop.f32.mrf.mxu1 }
 0x46e   : > { %v2436_v33 = vadd.f32 %v1675_v58, %v991_v28 }
 0x475   : > { %v994_v3 = vpop.f32.mrf.mxu1 }
 0x476   : > { %v2433_v32 = vadd.f32 %v1675_v58, %v994_v3 }
 0x47d   : > { %v997_v31 = vpop.f32.mrf.mxu1 }
 0x47e   : > { %v2430_v57 = vadd.f32 %v1675_v58, %v997_v31 }
 0x485   : > { %v1000_v13 = vpop.f32.mrf.mxu1 }
 0x486   : > { %v2428_v5 = vadd.f32 %v1675_v58, %v1000_v13  ;;  %v1222_v13 = vld [vmem:[#allocation10 + $0x178] sm:$0xff] }
 0x487   : > { %1228 = vmatpush.msra.mxu0 %v1222_v13 }
 0x488   : > { %1003 = vmatpush.msra.mxu2 %v2428_v5 }
 0x48a   : > { %1004 = vmatpush.msra.mxu2 %v2430_v57 }
 0x48c   : > { %1005 = vmatpush.msra.mxu2 %v2433_v32 }
 0x48e   : > { %1006 = vmatpush.msra.mxu2 %v2436_v33 }
 0x490   : > { %1007 = vmatpush.msra.mxu2 %v2439_v12 }
 0x492   : > { %1008 = vmatpush.msra.mxu2 %v2442_v34 }
 0x494   : > { %1009 = vmatpush.msra.mxu2 %v2445_v6 }
 0x496   : > { %1010 = vmatpush.msra.mxu2 %v2448_v36 }
 0x498   : > { %1011 = vmatpush.msra.mxu2 %v2451_v11 }
 0x49a   : > { %1012 = vmatpush.msra.mxu2 %v2454_v37 }
 0x49c   : > { %1013 = vmatpush.msra.mxu2 %v2457_v1 }
 0x49e   : > { %1014 = vmatpush.msra.mxu2 %v2460_v40 }
 0x4a0   : > { %1015 = vmatpush.msra.mxu2 %v2463_v10 }
 0x4a2   : > { %1016 = vmatpush.msra.mxu2 %v2466_v55 }
 0x4a4   : > { %1017 = vmatpush.msra.mxu2 %v959_v0 }
 0x4a6   : > { %1018 = vmatpush.msra.mxu2 %v956_v56 }
 0x4a7   : > { %1019 = vmatmul.f32.vlgmr.msra.gmra.mxu2 %v2240_v20  ;;  %v1118_v20 = vld [vmem:[#allocation9 + $0x170] sm:$0xff] }
 0x4a8   : > { %1126 = vmatpush.msra.mxu3 %v1118_v20 }
 0x4af   : > { %1022 = vmatmul.f32.gmra.mxu2 %v2262_v26  ;;  %v1117_v26 = vld [vmem:[#allocation9 + $0x168] sm:$0xff] }
 0x4b0   : > { %1127 = vmatpush.msra.mxu3 %v1117_v26  ;;  %v1215_v26 = vld [vmem:[#allocation10 + $0x140] sm:$0xff] }
 0x4b7   : > { %1025 = vmatmul.f32.gmra.mxu2 %v2274_v38  ;;  %v1116_v38 = vld [vmem:[#allocation9 + $0x160] sm:$0xff] }
 0x4b8   : > { %1128 = vmatpush.msra.mxu3 %v1116_v38  ;;  %v1213_v38 = vld [vmem:[#allocation10 + $0x130] sm:$0xff] }
 0x4bf   : > { %1028 = vmatmul.f32.gmra.mxu2 %v2286_v46  ;;  %v1115_v46 = vld [vmem:[#allocation9 + $0x158] sm:$0xff] }
 0x4c0   : > { %1129 = vmatpush.msra.mxu3 %v1115_v46  ;;  %v1212_v46 = vld [vmem:[#allocation10 + $0x128] sm:$0xff] }
 0x4c7   : > { %1031 = vmatmul.f32.gmra.mxu2 %v2242_v21  ;;  %v1114_v21 = vld [vmem:[#allocation9 + $0x150] sm:$0xff] }
 0x4c8   : > { %1130 = vmatpush.msra.mxu3 %v1114_v21 }
 0x4cf   : > { %1034 = vmatmul.f32.gmra.mxu2 %v2264_v27  ;;  %v1113_v27 = vld [vmem:[#allocation9 + $0x148] sm:$0xff] }
 0x4d0   : > { %1131 = vmatpush.msra.mxu3 %v1113_v27  ;;  %v1211_v27 = vld [vmem:[#allocation10 + $0x120] sm:$0xff] }
 0x4d7   : > { %1037 = vmatmul.f32.gmra.mxu2 %v2276_v39  ;;  %v1112_v39 = vld [vmem:[#allocation9 + $0x140] sm:$0xff] }
 0x4d8   : > { %1132 = vmatpush.msra.mxu3 %v1112_v39 }
 0x4df   : > { %1040 = vmatmul.f32.gmra.mxu2 %v2288_v47  ;;  %v1109_v47 = vld [vmem:[#allocation9 + $0x128] sm:$0xff] }
 0x4e7   : > { %1043 = vmatmul.f32.gmra.mxu2 %v2249_v22  ;;  %v1111_v22 = vld [vmem:[#allocation9 + $0x138] sm:$0xff] }
 0x4e8   : > { %1133 = vmatpush.msra.mxu3 %v1111_v22 }
 0x4ef   : > { %1046 = vmatmul.f32.gmra.mxu2 %v2266_v29  ;;  %v1110_v29 = vld [vmem:[#allocation9 + $0x130] sm:$0xff] }
 0x4f0   : > { %1134 = vmatpush.msra.mxu3 %v1110_v29  ;;  %v1209_v29 = vld [vmem:[#allocation10 + $0x110] sm:$0xff] }
 0x4f2   : > { %1135 = vmatpush.msra.mxu3 %v1109_v47 }
 0x4f4   : > { %1136 = vmatpush.msra.mxu3 %v1108_v44  ;;  %v1208_v44 = vld [vmem:[#allocation10 + $0x108] sm:$0xff] }
 0x4f6   : > { %1137 = vmatpush.msra.mxu3 %v1107_v9 }
 0x4f7   : > { %1049 = vmatmul.f32.gmra.mxu2 %v2278_v41  ;;  %v1105_v41 = vld [vmem:[#allocation9 + $0x108] sm:$0xff] }
 0x4f8   : > { %1138 = vmatpush.msra.mxu3 %v1106_v45 }
 0x4fa   : > { %1139 = vmatpush.msra.mxu3 %v1105_v41  ;;  %v1207_v41 = vld [vmem:[#allocation10 + $0x100] sm:$0xff] }
 0x4fc   : > { %1140 = vmatpush.msra.mxu3 %v1104_v54 }
 0x4ff   : > { %1052 = vmatmul.f32.gmra.mxu2 %v2290_v49  ;;  %v2486_v49 = vstv %s1069_s17  ;;  %s1863_s17 = scalar_lea.hbm %s2581_s7, 1024 }
 0x500   : > { %v1071_v48 = vmul.f32 %v2486_v49, %v956_v56  ;;  %v1075_v4 = vmul.f32 %v2486_v49, %v2460_v40  ;;  %v1076_v18 = vmul.f32 %v2486_v49, %v2457_v1  ;;  %v1077_v52 = vmul.f32 %v2486_v49, %v2454_v37  ;;  %v1221_v37 = vld [vmem:[#allocation10 + $0x170] sm:$0xff]  ;;  %v1220_v1 = vld [vmem:[#allocation10 + $0x168] sm:$0xff]  ;;  %p1865_p2 = scmp.lt.s32.totalorder %s1863_s17, %s1859_s28 }
 0x501   : > { %v1078_v25 = vmul.f32 %v2486_v49, %v2451_v11  ;;  %v1079_v59 = vmul.f32 %v2486_v49, %v2448_v36  ;;  %v1080_v3 = vmul.f32 %v2486_v49, %v2445_v6  ;;  %1229 = vmatpush.msra.mxu0 %v1221_v37  ;;  %v1081_v11 = vmul.f32 %v2486_v49, %v2442_v34  ;;  %v1216_v56 = vld [vmem:[#allocation10 + $0x148] sm:$0xff]  ;;  %v1214_v34 = vld [vmem:[#allocation10 + $0x138] sm:$0xff] }
 0x502   : > { %v1082_v6 = vmul.f32 %v2486_v49, %v2439_v12  ;;  %v1083_v21 = vmul.f32 %v2486_v49, %v2436_v33  ;;  %v1210_v12 = vld [vmem:[#allocation10 + $0x118] sm:$0xff]  ;;  %v1084_v47 = vmul.f32 %v2486_v49, %v2433_v32  ;;  %v1085_v33 = vmul.f32 %v2486_v49, %v2430_v57  ;;  %p1866_p9 = por %p1865_p2, %p1864_p7 }
 0x503   : > { %1230 = vmatpush.msra.mxu0 %v1220_v1  ;;  %v1676_v32 = vld [vmem:[%s2578_s4 + $0x2] ss:$0 sm:$0xff] }
 0x504   : > { %p1867_p10 = pnand %p1866_p9, %p1862_p8 }
 0x507   : > { %1055 = vmatmul.f32.gmra.mxu2 %v2252_v23  ;;  %v1072_v23 = vmul.f32 %v2486_v49, %v959_v0  ;;  %v1217_v0 = vld [vmem:[#allocation10 + $0x150] sm:$0xff] }
 0x50f   : > { %1058 = vmatmul.f32.gmra.mxu2 %v2268_v30  ;;  %v1073_v30 = vmul.f32 %v2486_v49, %v2466_v55  ;;  %v1218_v55 = vld [vmem:[#allocation10 + $0x158] sm:$0xff] }
 0x517   : > { %1061 = vmatmul.f32.gmra.mxu2 %v2280_v42 }
 0x51f   : > { %1064 = vmatmul.f32.gmra.mxu2 %v2292_v50  ;;  %v1074_v50 = vmul.f32 %v2486_v49, %v2463_v10  ;;  %v1219_v10 = vld [vmem:[#allocation10 + $0x160] sm:$0xff] }
 0x520   : > { %1231 = vmatpush.msra.mxu0 %v1219_v10 }
 0x522   : > { %1232 = vmatpush.msra.mxu0 %v1218_v55 }
 0x524   : > { %1233 = vmatpush.msra.mxu0 %v1217_v0 }
 0x526   : > { %1234 = vmatpush.msra.mxu0 %v1216_v56 }
 0x528   : > { %1235 = vmatpush.msra.mxu0 %v1215_v26 }
 0x52a   : > { %v1020_v8 = vpop.f32.mrf.mxu2  ;;  %1236 = vmatpush.msra.mxu0 %v1214_v34 }
 0x52b   : > { %v1087_v51 = vadd.f32 %v1071_v48, %v1020_v8  ;;  %v1086_v8 = vmul.f32 %v2486_v49, %v2428_v5 }
 0x52c   : > { %1237 = vmatpush.msra.mxu0 %v1213_v38 }
 0x52d   : > { %1141 = vmatmul.f32.vlgmr.msra.gmra.mxu3 %v1087_v51 }
 0x52e   : > { %1238 = vmatpush.msra.mxu0 %v1212_v46 }
 0x530   : > { %1239 = vmatpush.msra.mxu0 %v1211_v27 }
 0x532   : > { %v1023_v63 = vpop.f32.mrf.mxu2  ;;  %1240 = vmatpush.msra.mxu0 %v1210_v12 }
 0x533   : > { %v1088_v14 = vadd.f32 %v1072_v23, %v1023_v63 }
 0x534   : > { %1241 = vmatpush.msra.mxu0 %v1209_v29 }
 0x535   : > { %1144 = vmatmul.f32.gmra.mxu3 %v1088_v14 }
 0x536   : > { %1242 = vmatpush.msra.mxu0 %v1208_v44 }
 0x538   : > { %1243 = vmatpush.msra.mxu0 %v1207_v41 }
 0x53a   : > { %v1026_v42 = vpop.f32.mrf.mxu2 }
 0x53b   : > { %v1089_v53 = vadd.f32 %v1073_v30, %v1026_v42 }
 0x53d   : > { %1147 = vmatmul.f32.gmra.mxu3 %v1089_v53 }
 0x542   : > { %v1029_v62 = vpop.f32.mrf.mxu2 }
 0x543   : > { %v1090_v15 = vadd.f32 %v1074_v50, %v1029_v62 }
 0x545   : > { %1150 = vmatmul.f32.gmra.mxu3 %v1090_v15 }
 0x54a   : > { %v1032_v7 = vpop.f32.mrf.mxu2 }
 0x54b   : > { %v1091_v17 = vadd.f32 %v1075_v4, %v1032_v7 }
 0x54d   : > { %1153 = vmatmul.f32.gmra.mxu3 %v1091_v17 }
 0x552   : > { %v1035_v61 = vpop.f32.mrf.mxu2 }
 0x553   : > { %v1092_v19 = vadd.f32 %v1076_v18, %v1035_v61 }
 0x555   : > { %1156 = vmatmul.f32.gmra.mxu3 %v1092_v19 }
 0x55a   : > { %v1038_v24 = vpop.f32.mrf.mxu2 }
 0x55b   : > { %v1093_v60 = vadd.f32 %v1077_v52, %v1038_v24 }
 0x55d   : > { %1159 = vmatmul.f32.gmra.mxu3 %v1093_v60 }
 0x562   : > { %v1041_v2 = vpop.f32.mrf.mxu2 }
 0x563   : > { %v1094_v35 = vadd.f32 %v1078_v25, %v1041_v2 }
 0x565   : > { %1162 = vmatmul.f32.gmra.mxu3 %v1094_v35 }
 0x56a   : > { %v1044_v16 = vpop.f32.mrf.mxu2 }
 0x56b   : > { %v1095_v28 = vadd.f32 %v1079_v59, %v1044_v16 }
 0x56d   : > { %1165 = vmatmul.f32.gmra.mxu3 %v1095_v28 }
 0x572   : > { %v1047_v31 = vpop.f32.mrf.mxu2 }
 0x573   : > { %v1096_v58 = vadd.f32 %v1080_v3, %v1047_v31 }
 0x575   : > { %1168 = vmatmul.f32.gmra.mxu3 %v1096_v58 }
 0x57a   : > { %v1050_v40 = vpop.f32.mrf.mxu2 }
 0x57b   : > { %v1097_v36 = vadd.f32 %v1081_v11, %v1050_v40 }
 0x57d   : > { %1171 = vmatmul.f32.gmra.mxu3 %v1097_v36 }
 0x582   : > { %v1053_v43 = vpop.f32.mrf.mxu2 }
 0x583   : > { %v1098_v20 = vadd.f32 %v1082_v6, %v1053_v43 }
 0x585   : > { %1174 = vmatmul.f32.gmra.mxu3 %v1098_v20 }
 0x58a   : > { %v1056_v39 = vpop.f32.mrf.mxu2 }
 0x58b   : > { %v1099_v22 = vadd.f32 %v1083_v21, %v1056_v39  ;;  %v1677_v39 = vld [vmem:[#allocation12 + $0x2] ss:$0 sm:$0xff] }
 0x58d   : > { %1177 = vmatmul.f32.gmra.mxu3 %v1099_v22 }
 0x592   : > { %v1059_v9 = vpop.f32.mrf.mxu2 }
 0x593   : > { %v1100_v45 = vadd.f32 %v1084_v47, %v1059_v9 }
 0x595   : > { %1180 = vmatmul.f32.gmra.mxu3 %v1100_v45 }
 0x59a   : > { %v1062_v54 = vpop.f32.mrf.mxu2 }
 0x59b   : > { %v1101_v48 = vadd.f32 %v1085_v33, %v1062_v54 }
 0x59d   : > { %1183 = vmatmul.f32.gmra.mxu3 %v1101_v48 }
 0x5a2   : > { %v1065_v51 = vpop.f32.mrf.mxu2 }
 0x5a3   : > { %v1102_v23 = vadd.f32 %v1086_v8, %v1065_v51 }
 0x5a5   : > { %1186 = vmatmul.f32.gmra.mxu3 %v1102_v23 }
 0x5b0   : > { %v1142_v63 = vpop.f32.mrf.mxu3 }
 0x5b1   : > { %v1143_v14 = vadd.f32 %v1676_v32, %v1142_v63 }
 0x5b3   : > { %v1190_v30 = vmax.f32 %v1143_v14, 0.0 }
 0x5b5   : > { %1244 = vmatmul.f32.vlgmr.msra.gmra.mxu0 %v1190_v30 }
 0x5b8   : > { %v1145_v42 = vpop.f32.mrf.mxu3 }
 0x5b9   : > { %v1146_v53 = vadd.f32 %v1676_v32, %v1145_v42 }
 0x5bb   : > { %v1191_v57 = vmax.f32 %v1146_v53, 0.0 }
 0x5bd   : > { %1247 = vmatmul.f32.gmra.mxu0 %v1191_v57 }
 0x5c0   : > { %v1148_v50 = vpop.f32.mrf.mxu3 }
 0x5c1   : > { %v1149_v62 = vadd.f32 %v1676_v32, %v1148_v50 }
 0x5c3   : > { %v1192_v15 = vmax.f32 %v1149_v62, 0.0 }
 0x5c5   : > { %1250 = vmatmul.f32.gmra.mxu0 %v1192_v15 }
 0x5c8   : > { %v1151_v5 = vpop.f32.mrf.mxu3 }
 0x5c9   : > { %v1152_v49 = vadd.f32 %v1676_v32, %v1151_v5 }
 0x5cb   : > { %v1193_v4 = vmax.f32 %v1152_v49, 0.0 }
 0x5cd   : > { %1253 = vmatmul.f32.gmra.mxu0 %v1193_v4 }
 0x5d0   : > { %v1154_v7 = vpop.f32.mrf.mxu3 }
 0x5d1   : > { %v1155_v17 = vadd.f32 %v1676_v32, %v1154_v7 }
 0x5d3   : > { %v1194_v18 = vmax.f32 %v1155_v17, 0.0 }
 0x5d5   : > { %1256 = vmatmul.f32.gmra.mxu0 %v1194_v18 }
 0x5d8   : > { %v1157_v61 = vpop.f32.mrf.mxu3 }
 0x5d9   : > { %v1158_v19 = vadd.f32 %v1676_v32, %v1157_v61 }
 0x5db   : > { %v1195_v52 = vmax.f32 %v1158_v19, 0.0 }
 0x5dd   : > { %1259 = vmatmul.f32.gmra.mxu0 %v1195_v52 }
 0x5e0   : > { %v1160_v24 = vpop.f32.mrf.mxu3 }
 0x5e1   : > { %v1161_v60 = vadd.f32 %v1676_v32, %v1160_v24 }
 0x5e3   : > { %v1196_v25 = vmax.f32 %v1161_v60, 0.0 }
 0x5e5   : > { %1262 = vmatmul.f32.gmra.mxu0 %v1196_v25 }
 0x5e8   : > { %v1163_v2 = vpop.f32.mrf.mxu3 }
 0x5e9   : > { %v1164_v35 = vadd.f32 %v1676_v32, %v1163_v2 }
 0x5eb   : > { %v1197_v59 = vmax.f32 %v1164_v35, 0.0 }
 0x5ed   : > { %1265 = vmatmul.f32.gmra.mxu0 %v1197_v59 }
 0x5f0   : > { %v1166_v16 = vpop.f32.mrf.mxu3 }
 0x5f1   : > { %v1167_v28 = vadd.f32 %v1676_v32, %v1166_v16 }
 0x5f3   : > { %v1198_v3 = vmax.f32 %v1167_v28, 0.0 }
 0x5f5   : > { %1268 = vmatmul.f32.gmra.mxu0 %v1198_v3 }
 0x5f8   : > { %v1169_v31 = vpop.f32.mrf.mxu3 }
 0x5f9   : > { %v1170_v58 = vadd.f32 %v1676_v32, %v1169_v31 }
 0x5fb   : > { %v1199_v13 = vmax.f32 %v1170_v58, 0.0 }
 0x5fd   : > { %1271 = vmatmul.f32.gmra.mxu0 %v1199_v13 }
 0x600   : > { %v1172_v37 = vpop.f32.mrf.mxu3 }
 0x601   : > { %v1173_v11 = vadd.f32 %v1676_v32, %v1172_v37 }
 0x603   : > { %v1200_v1 = vmax.f32 %v1173_v11, 0.0 }
 0x605   : > { %1274 = vmatmul.f32.gmra.mxu0 %v1200_v1 }
 0x608   : > { %v1175_v40 = vpop.f32.mrf.mxu3 }
 0x609   : > { %v1176_v36 = vadd.f32 %v1676_v32, %v1175_v40 }
 0x60b   : > { %v1201_v10 = vmax.f32 %v1176_v36, 0.0 }
 0x60d   : > { %1277 = vmatmul.f32.gmra.mxu0 %v1201_v10 }
 0x610   : > { %v1178_v55 = vpop.f32.mrf.mxu3 }
 0x611   : > { %v1179_v0 = vadd.f32 %v1676_v32, %v1178_v55 }
 0x613   : > { %v1202_v6 = vmax.f32 %v1179_v0, 0.0 }
 0x615   : > { %1280 = vmatmul.f32.gmra.mxu0 %v1202_v6 }
 0x618   : > { %v1181_v56 = vpop.f32.mrf.mxu3 }
 0x619   : > { %v1182_v43 = vadd.f32 %v1676_v32, %v1181_v56 }
 0x61b   : > { %v1203_v20 = vmax.f32 %v1182_v43, 0.0 }
 0x61d   : > { %1283 = vmatmul.f32.gmra.mxu0 %v1203_v20 }
 0x620   : > { %v1184_v26 = vpop.f32.mrf.mxu3 }
 0x621   : > { %v1185_v34 = vadd.f32 %v1676_v32, %v1184_v26 }
 0x623   : > { %v1204_v38 = vmax.f32 %v1185_v34, 0.0 }
 0x625   : > { %1286 = vmatmul.f32.gmra.mxu0 %v1204_v38 }
 0x628   : > { %v1187_v46 = vpop.f32.mrf.mxu3 }
 0x629   : > { %v1188_v21 = vadd.f32 %v1676_v32, %v1187_v46 }
 0x62b   : > { %v1205_v27 = vmax.f32 %v1188_v21, 0.0 }
 0x62d   : > { %1289 = vmatmul.f32.gmra.mxu0 %v1205_v27 }
 0x632   : > { %v1245_v22 = vpop.f32.mrf.mxu0 }
 0x633   : > { %v1246_v12 = vadd.f32 %v1677_v39, %v1245_v22 }
 0x635   : > { %1293 = vst [vmem:[%s2522_s16] sm:$0xff] %v1246_v12 }
 0x63a   : > { %v1248_v29 = vpop.f32.mrf.mxu0 }
 0x63b   : > { %v1249_v47 = vadd.f32 %v1677_v39, %v1248_v29 }
 0x63d   : > { %1294 = vst [vmem:[%s2522_s16 + $0x8] sm:$0xff] %v1249_v47 }
 0x642   : > { %v1251_v44 = vpop.f32.mrf.mxu0 }
 0x643   : > { %v1252_v9 = vadd.f32 %v1677_v39, %v1251_v44 }
 0x645   : > { %1295 = vst [vmem:[%s2522_s16 + $0x10] sm:$0xff] %v1252_v9 }
 0x64a   : > { %v1254_v45 = vpop.f32.mrf.mxu0 }
 0x64b   : > { %v1255_v41 = vadd.f32 %v1677_v39, %v1254_v45 }
 0x64d   : > { %1296 = vst [vmem:[%s2522_s16 + $0x18] sm:$0xff] %v1255_v41 }
 0x652   : > { %v1257_v33 = vpop.f32.mrf.mxu0 }
 0x653   : > { %v1258_v54 = vadd.f32 %v1677_v39, %v1257_v33 }
 0x655   : > { %1297 = vst [vmem:[%s2522_s16 + $0x20] sm:$0xff] %v1258_v54 }
 0x65a   : > { %v1260_v48 = vpop.f32.mrf.mxu0 }
 0x65b   : > { %v1261_v8 = vadd.f32 %v1677_v39, %v1260_v48 }
 0x65d   : > { %1298 = vst [vmem:[%s2522_s16 + $0x28] sm:$0xff] %v1261_v8 }
 0x662   : > { %v1263_v51 = vpop.f32.mrf.mxu0 }
 0x663   : > { %v1264_v23 = vadd.f32 %v1677_v39, %v1263_v51 }
 0x665   : > { %1299 = vst [vmem:[%s2522_s16 + $0x30] sm:$0xff] %v1264_v23 }
 0x66a   : > { %v1266_v32 = vpop.f32.mrf.mxu0 }
 0x66b   : > { %v1267_v63 = vadd.f32 %v1677_v39, %v1266_v32 }
 0x66d   : > { %1300 = vst [vmem:[%s2522_s16 + $0x38] sm:$0xff] %v1267_v63 }
 0x672   : > { %v1269_v14 = vpop.f32.mrf.mxu0 }
 0x673   : > { %v1270_v30 = vadd.f32 %v1677_v39, %v1269_v14 }
 0x675   : > { %1301 = vst [vmem:[%s2522_s16 + $0x40] sm:$0xff] %v1270_v30 }
 0x67a   : > { %v1272_v42 = vpop.f32.mrf.mxu0 }
 0x67b   : > { %v1273_v53 = vadd.f32 %v1677_v39, %v1272_v42 }
 0x67d   : > { %1302 = vst [vmem:[%s2522_s16 + $0x48] sm:$0xff] %v1273_v53 }
 0x682   : > { %v1275_v57 = vpop.f32.mrf.mxu0 }
 0x683   : > { %v1276_v50 = vadd.f32 %v1677_v39, %v1275_v57 }
 0x685   : > { %1303 = vst [vmem:[%s2522_s16 + $0x50] sm:$0xff] %v1276_v50 }
 0x68a   : > { %v1278_v62 = vpop.f32.mrf.mxu0 }
 0x68b   : > { %v1279_v15 = vadd.f32 %v1677_v39, %v1278_v62 }
 0x68d   : > { %1304 = vst [vmem:[%s2522_s16 + $0x58] sm:$0xff] %v1279_v15 }
 0x692   : > { %v1281_v5 = vpop.f32.mrf.mxu0 }
 0x693   : > { %v1282_v49 = vadd.f32 %v1677_v39, %v1281_v5 }
 0x695   : > { %1305 = vst [vmem:[%s2522_s16 + $0x60] sm:$0xff] %v1282_v49 }
 0x69a   : > { %v1284_v4 = vpop.f32.mrf.mxu0 }
 0x69b   : > { %v1285_v7 = vadd.f32 %v1677_v39, %v1284_v4 }
 0x69d   : > { %1306 = vst [vmem:[%s2522_s16 + $0x68] sm:$0xff] %v1285_v7 }
 0x6a2   : > { %v1287_v17 = vpop.f32.mrf.mxu0 }
 0x6a3   : > { %v1288_v18 = vadd.f32 %v1677_v39, %v1287_v17 }
 0x6a5   : > { %1307 = vst [vmem:[%s2522_s16 + $0x70] sm:$0xff] %v1288_v18 }
 0x6aa   : > { %v1290_v61 = vpop.f32.mrf.mxu0 }
 0x6ab   : > { %v1291_v19 = vadd.f32 %v1677_v39, %v1290_v61 }
 0x6ad   : > { %1308 = vst [vmem:[%s2522_s16 + $0x78] sm:$0xff] %v1291_v19 }
 0x6ae   : > { %1870 = shalt.err (!%p1867_p10)
}
 0x6af   : > { %s1938_s19 = smov 128   ;;  %s1939_s16 = smov 8  }
 0x6b0   : > { %1589 = dma.vmem_to_hbm [thread:$0]  (%p2078_p5), %s1323_s23, 2048, %s1325_s29, %s1310_s9, %s1938_s19, %s1938_s19, %s1939_s16  }
 0x6b1 PF: > { %p1626_p11 = scmp.ge.s32.totalorder %s1925_s27, 2  ;;  %s1339_s12 = sand.u32 1, %s1913_s24  }
 0x6b2   : > { %s1340_s30 = scalar_lea.sflag [#allocation4], %s1339_s12 }
 0x6b3   : > { %p1612_p12 = pnand %p1626_p11, %p2015_p6 }
 0x6b5   : > { %p1613_p13 = pneg %p1612_p12 }
 0x6b7   : > { %1908 = dma.done.wait (%p1613_p13), %s1340_s30, 2048  }
 0x6b8   : > { %1910 = vsyncadd (%p1613_p13), %s1340_s30, 4294965248  ;;  %p23_p0 = scmp.ge.s32.totalorder %s2064_s11, 10   ;;  %s2594_s24 = smov %s1917_s25 }
 0x6b9   : > { %s2595_s25 = smov %s1921_s26  ;;  %s2596_s26 = smov %s2074_s21 }
 0x6ba   : > { %s2597_s27 = smov %s2064_s11  ;;  %25 = sbr.rel (!%p23_p0) target bundleno = 10 (0xa), region = 123 }
 0x6bf   :  { %1346 = vsyncpa [#allocation3], 1 }
 0x6c0   :  { %1348 = vsyncpa [#allocation3 + $0x1], 1 }
 0x6c1   :  { %1349 = vsyncpa [#allocation8], 1 }
 0x6c2   :  { %1351 = vsyncpa [#allocation8 + $0x1], 1 }
 0x6c3   :  { %1352 = vsyncpa [#allocation11], 1 }
 0x6c4   :  { %1353 = vsyncpa [#allocation4], 1 }
 0x6c5   :  { %1355 = vsyncpa [#allocation4 + $0x1], 1 }
 0x6c6   :  { %1356 = vsyncpa [#allocation5], 1 }
 0x6c7   :  { %1358 = vsyncpa [#allocation5 + $0x1], 1 }

</bundles_post_ra>
